<compile_context>
chip_gen: v5e
topology: v5e:2x2
jax: 0.10.0
libtpu: 0.0.40
codegen_flags: <defaults>
</compile_context>

<pallas_src>
import functools

import jax
import jax.numpy as jnp
from jax import lax
from jax.experimental import pallas as pl
from jax.experimental.pallas import tpu as pltpu

LN_EPS = 1e-5                      # PyTorch nn.LayerNorm default eps
MATMUL_DTYPE = jnp.bfloat16        # MXU operand dtype (accumulation stays f32)


def _round_up(x, m):
    return ((x + m - 1) // m) * m


def _bf16(a):
    return a.astype(MATMUL_DTYPE)


_VMEM_LIMIT = None


def _vmem_limit():
    """~75-80% of physical VMEM: headroom for internal scratch / double buffers."""
    global _VMEM_LIMIT
    if _VMEM_LIMIT is None:
        try:
            cap = int(pltpu.get_tpu_info().vmem_capacity_bytes)
        except Exception:
            cap = 0
        if cap < 32 * 1024 * 1024:
            cap = 64 * 1024 * 1024          # conservative fallback (v7x-sized)
        _VMEM_LIMIT = int(min(cap - 16 * 1024 * 1024, int(cap * 0.8)))
    return _VMEM_LIMIT


def _const_spec(a):
    zeros = (0,) * a.ndim
    return pl.BlockSpec(a.shape, lambda i: zeros)


def _layer_norm(h, gamma, beta):
    mean = jnp.mean(h, axis=-1, keepdims=True)
    var = jnp.mean(jnp.square(h - mean), axis=-1, keepdims=True)
    return (h - mean) * lax.rsqrt(var + LN_EPS) * gamma + beta


# ---------------------------------------------------------------------------
# Generic row-tiled pallas_call: rows = flattened (T*B) tokens, features on lanes.
# Grid over row blocks ("parallel" -> megacore sharding), weights broadcast.
# ---------------------------------------------------------------------------
def _rowwise_call(kernel, n_rows, row_inputs, const_inputs, out_cols, *, row_block=1024):
    tr = min(row_block, _round_up(n_rows, 8))
    grid = (pl.cdiv(n_rows, tr),)
    in_specs = ([pl.BlockSpec((tr, a.shape[1]), lambda i: (i, 0)) for a in row_inputs]
                + [_const_spec(a) for a in const_inputs])
    out_specs = tuple(pl.BlockSpec((tr, c), lambda i: (i, 0)) for c in out_cols)
    out_shapes = tuple(jax.ShapeDtypeStruct((n_rows, c), jnp.float32) for c in out_cols)
    if len(out_cols) == 1:
        out_specs, out_shapes = out_specs[0], out_shapes[0]
    return pl.pallas_call(
        kernel,
        out_shape=out_shapes,
        grid=grid,
        in_specs=in_specs,
        out_specs=out_specs,
        compiler_params=pltpu.CompilerParams(
            dimension_semantics=("parallel",),
            vmem_limit_bytes=_vmem_limit()),
    )(*row_inputs, *const_inputs)


# ---------------------------------------------------------------------------
# Kernel A: feature MLP (Linear -> LN -> ReLU) x 2, fused with the hoisted LSTM
#           layer-0 input projection for both directions.
#           x: (rows, 16)  ->  zf, zb: (rows, 4H)   (gate pre-activations incl. bias)
# ---------------------------------------------------------------------------
def _feat_proj0_kernel(x_ref, w1_ref, b1_ref, g1_ref, be1_ref,
                       w2_ref, b2_ref, g2_ref, be2_ref,
                       wif_ref, bif_ref, wib_ref, bib_ref,
                       zf_ref, zb_ref):
    x = x_ref[...].astype(MATMUL_DTYPE)
    h = jnp.dot(x, w1_ref[...], preferred_element_type=jnp.float32) + b1_ref[...]
    h = jnp.maximum(_layer_norm(h, g1_ref[...], be1_ref[...]), 0.0)
    h = (jnp.dot(h.astype(MATMUL_DTYPE), w2_ref[...],
                 preferred_element_type=jnp.float32) + b2_ref[...])
    h = jnp.maximum(_layer_norm(h, g2_ref[...], be2_ref[...]), 0.0)
    hq = h.astype(MATMUL_DTYPE)
    # hoisted x @ W_ih + (b_ih + b_hh), forward and backward directions
    zf_ref[...] = jnp.dot(hq, wif_ref[...], preferred_element_type=jnp.float32) + bif_ref[...]
    zb_ref[...] = jnp.dot(hq, wib_ref[...], preferred_element_type=jnp.float32) + bib_ref[...]


def feature_and_proj0(x2d, p):
    H = p["w_fe1"].shape[1]
    consts = [_bf16(p["w_fe1"]), p["b_fe1"], p["g_fe1"], p["be_fe1"],
              _bf16(p["w_fe2"]), p["b_fe2"], p["g_fe2"], p["be_fe2"],
              _bf16(p["wih0f"]), p["b0f"], _bf16(p["wih0b"]), p["b0b"]]
    return _rowwise_call(_feat_proj0_kernel, x2d.shape[0], [x2d], consts,
                         (4 * H, 4 * H))


# ---------------------------------------------------------------------------
# Kernel B: one bidirectional LSTM layer recurrence, streamed over T-chunks.
#           zf/zb: (T, B, 4H) gate pre-activations (x @ W_ih + b), whh: (2, H, 4H) bf16.
#           Grid = T-chunks ("arbitrary"); (h, c) carries live in VMEM scratch across
#           grid steps; the bwd direction streams its chunks in reverse order.
#           Gate packing is (i, f, o, g): one contiguous sigmoid slice + one tanh slice.
# ---------------------------------------------------------------------------
def _bilstm_rec_kernel(zf_ref, zb_ref, whh_ref, yf_ref, yb_ref,
                       hf_sc, cf_sc, hb_sc, cb_sc, *, Tc, B, H):
    @pl.when(pl.program_id(0) == 0)
    def _():
        hf_sc[...] = jnp.zeros_like(hf_sc)
        cf_sc[...] = jnp.zeros_like(cf_sc)
        hb_sc[...] = jnp.zeros_like(hb_sc)
        cb_sc[...] = jnp.zeros_like(cb_sc)

    # loop-invariant weight reads hoisted out of the serial loop (bf16: half the bytes)
    whh_f = whh_ref[0]
    whh_b = whh_ref[1]

    def gates(z):
        s = jax.nn.sigmoid(z[:, :3 * H])
        return s[:, :H], s[:, H:2 * H], s[:, 2 * H:3 * H], jnp.tanh(z[:, 3 * H:])

    def step(s, carry):
        hf, cf, hb, cb = carry
        sb = Tc - 1 - s
        # two independent (B,H)x(H,4H) matmuls -> they overlap in the MXU pipeline
        zf = zf_ref[s] + jnp.dot(hf.astype(MATMUL_DTYPE), whh_f,
                                 preferred_element_type=jnp.float32)
        zb = zb_ref[sb] + jnp.dot(hb.astype(MATMUL_DTYPE), whh_b,
                                  preferred_element_type=jnp.float32)
        i_f, f_f, o_f, g_f = gates(zf)
        cf = f_f * cf + i_f * g_f
        hf = o_f * jnp.tanh(cf)
        i_b, f_b, o_b, g_b = gates(zb)
        cb = f_b * cb + i_b * g_b
        hb = o_b * jnp.tanh(cb)
        yf_ref[s] = hf
        yb_ref[sb] = hb
        return hf, cf, hb, cb

    hf, cf, hb, cb = lax.fori_loop(
        0, Tc, step, (hf_sc[...], cf_sc[...], hb_sc[...], cb_sc[...]))
    hf_sc[...] = hf
    cf_sc[...] = cf
    hb_sc[...] = hb
    cb_sc[...] = cb


def _choose_t_chunk(T, B, H, budget_bytes=8 * 1024 * 1024):
    # per-time-step streamed bytes: (zf+zb) in + (yf+yb) out, f32, double-buffered
    per_t = 2 * B * (4 * H + H) * 4 * 2
    tc = max(1, min(T, budget_bytes // max(per_t, 1)))
    while T % tc:
        tc -= 1
    return tc


def bilstm_recurrence(zf, zb, whh, H):
    # TODO(synk): on v7x the fwd/bwd chains could be split across the 2 TensorCores
    # (core_map / core-parallel direction axis); here they are interleaved in one loop.
    T, B, _ = zf.shape
    Tc = _choose_t_chunk(T, B, H)
    nT = T // Tc
    kern = functools.partial(_bilstm_rec_kernel, Tc=Tc, B=B, H=H)
    return pl.pallas_call(
        kern,
        out_shape=(jax.ShapeDtypeStruct((T, B, H), jnp.float32),
                   jax.ShapeDtypeStruct((T, B, H), jnp.float32)),
        grid=(nT,),
        in_specs=[pl.BlockSpec((Tc, B, 4 * H), lambda i: (i, 0, 0)),
                  pl.BlockSpec((Tc, B, 4 * H), lambda i: (nT - 1 - i, 0, 0)),
                  pl.BlockSpec((2, H, 4 * H), lambda i: (0, 0, 0))],
        out_specs=(pl.BlockSpec((Tc, B, H), lambda i: (i, 0, 0)),
                   pl.BlockSpec((Tc, B, H), lambda i: (nT - 1 - i, 0, 0))),
        scratch_shapes=[pltpu.VMEM((B, H), jnp.float32)] * 4,
        compiler_params=pltpu.CompilerParams(
            dimension_semantics=("arbitrary",),
            vmem_limit_bytes=_vmem_limit()),
    )(zf, zb, _bf16(whh))


# ---------------------------------------------------------------------------
# Kernel C: hoisted layer-1 LSTM input projection.  Layer-1 W_ih acts on [h_fwd|h_bwd];
#           it is pre-split so yf/yb are consumed directly (no concat materialized).
# ---------------------------------------------------------------------------
def _proj1_kernel(yf_ref, yb_ref, wff_ref, wfb_ref, bf_ref,
                  wbf_ref, wbb_ref, bb_ref, zf_ref, zb_ref):
    yf = yf_ref[...].astype(MATMUL_DTYPE)
    yb = yb_ref[...].astype(MATMUL_DTYPE)
    zf_ref[...] = (jnp.dot(yf, wff_ref[...], preferred_element_type=jnp.float32)
                   + jnp.dot(yb, wfb_ref[...], preferred_element_type=jnp.float32)
                   + bf_ref[...])
    zb_ref[...] = (jnp.dot(yf, wbf_ref[...], preferred_element_type=jnp.float32)
                   + jnp.dot(yb, wbb_ref[...], preferred_element_type=jnp.float32)
                   + bb_ref[...])


def layer1_proj(yf2, yb2, p):
    H = yf2.shape[1]
    consts = [_bf16(p["wih1_ff"]), _bf16(p["wih1_fb"]), p["b1f"],
              _bf16(p["wih1_bf"]), _bf16(p["wih1_bb"]), p["b1b"]]
    return _rowwise_call(_proj1_kernel, yf2.shape[0], [yf2, yb2], consts,
                         (4 * H, 4 * H))


# ---------------------------------------------------------------------------
# Kernel D (fused): attention scores (all 4 heads), softmax over time, per-head
#           pooling, and the output-head MLP, per batch block.  Scores stay on-chip
#           (VMEM scratch); pooled contexts are packed into one (Bt, 8H) buffer so fc1
#           is a single K=8H matmul.  The 2H attention input is split into fwd/bwd
#           halves; the per-head second linear is block-diagonal (wsc).
# ---------------------------------------------------------------------------
def _attn_head_kernel(yf_ref, yb_ref,
                      wa1f_ref, wa1b_ref, ba1_ref, wsc_ref, ba2_ref,
                      wf1_ref, bf1_ref, g1_ref, be1_ref,
                      wf2_ref, bf2_ref, g2_ref, be2_ref,
                      wf3_ref, bf3_ref,
                      out_ref, sc_sc, ctx_sc, *, T, H, n_heads):
    wa1f = wa1f_ref[...]
    wa1b = wa1b_ref[...]
    ba1 = ba1_ref[...]
    wsc = wsc_ref[...]
    ba2 = ba2_ref[...]

    def score_step(t, carry):
        hf = yf_ref[t].astype(MATMUL_DTYPE)                  # (Bt, H)
        hb = yb_ref[t].astype(MATMUL_DTYPE)
        t1 = jnp.tanh(jnp.dot(hf, wa1f, preferred_element_type=jnp.float32)
                      + jnp.dot(hb, wa1b, preferred_element_type=jnp.float32)
                      + ba1)
        sc_sc[t] = (jnp.dot(t1.astype(MATMUL_DTYPE), wsc,
                            preferred_element_type=jnp.float32) + ba2)
        return carry

    lax.fori_loop(0, T, score_step, 0)

    # softmax over time, per (batch row, head)
    sc = sc_sc[...]                                          # (T, Bt, n_heads)
    sc = sc - jnp.max(sc, axis=0, keepdims=True)
    e = jnp.exp(sc)
    wts = e / jnp.sum(e, axis=0, keepdims=True)

    # attention pooling into one (Bt, 8H) context buffer, torch concat order:
    # [head0_fwd | head0_bwd | head1_fwd | head1_bwd | ...]
    yf = yf_ref[...]                                         # (T, Bt, H)
    yb = yb_ref[...]
    for k in range(n_heads):                                 # static, n_heads = 4
        wk = wts[:, :, k:k + 1]                              # (T, Bt, 1)
        ctx_sc[:, 2 * H * k:2 * H * k + H] = jnp.sum(wk * yf, axis=0)
        ctx_sc[:, 2 * H * k + H:2 * H * (k + 1)] = jnp.sum(wk * yb, axis=0)

    # output head: one (Bt,8H)x(8H,H) matmul, then LN/ReLU -> fc2 -> LN/ReLU -> fc3
    h = (jnp.dot(ctx_sc[...].astype(MATMUL_DTYPE), wf1_ref[...],
                 preferred_element_type=jnp.float32) + bf1_ref[...])
    h = jnp.maximum(_layer_norm(h, g1_ref[...], be1_ref[...]), 0.0)
    h = (jnp.dot(h.astype(MATMUL_DTYPE), wf2_ref[...],
                 preferred_element_type=jnp.float32) + bf2_ref[...])
    h = jnp.maximum(_layer_norm(h, g2_ref[...], be2_ref[...]), 0.0)
    # fc3 (H//2 -> 1) as a lane reduction (avoids an N=1 matmul)
    out_ref[...] = jnp.sum(h * wf3_ref[...], axis=-1, keepdims=True) + bf3_ref[...]


def _choose_b_block(B, target=16):
    if B % 8 != 0:
        return B            # block must equal the full batch when not sublane-aligned
    bt = min(B, max(8, target - target % 8))
    while B % bt:
        bt -= 8
    return max(bt, 8)


def attention_and_head(yf1, yb1, p):
    T, B, H = yf1.shape
    n_heads = p["ba2"].shape[1]
    Bt = _choose_b_block(B)
    consts = [_bf16(p["wa1f"]), _bf16(p["wa1b"]), p["ba1"], _bf16(p["wsc"]), p["ba2"],
              _bf16(p["wf1"]), p["bf1"], p["g1"], p["be1"],
              _bf16(p["wf2"]), p["bf2"], p["g2"], p["be2"],
              p["wf3"], p["bf3"]]
    kern = functools.partial(_attn_head_kernel, T=T, H=H, n_heads=n_heads)
    return pl.pallas_call(
        kern,
        out_shape=jax.ShapeDtypeStruct((B, 1), jnp.float32),
        grid=(B // Bt,),
        in_specs=([pl.BlockSpec((T, Bt, H), lambda i: (0, i, 0)),
                   pl.BlockSpec((T, Bt, H), lambda i: (0, i, 0))]
                  + [_const_spec(a) for a in consts]),
        out_specs=pl.BlockSpec((Bt, 1), lambda i: (i, 0)),
        scratch_shapes=[pltpu.VMEM((T, Bt, n_heads), jnp.float32),
                        pltpu.VMEM((Bt, 2 * n_heads * H), jnp.float32)],
        compiler_params=pltpu.CompilerParams(
            dimension_semantics=("parallel",),
            vmem_limit_bytes=_vmem_limit()),
    )(yf1, yb1, *consts)


# ---------------------------------------------------------------------------
# Full forward
# ---------------------------------------------------------------------------
def lstm_ensemble_forward(x, p):
    # x: (B, T, 16) batch_first, like the PyTorch module.
    B, T, F = x.shape
    H = p["w_fe1"].shape[1]
    n = T * B
    # Time-major row order (row = t*B + b).  Only XLA-side layout op is this cheap
    # transpose of the raw 16-feature input; the reshapes below only merge/split
    # leading dims (free).
    xt = jnp.transpose(x, (1, 0, 2)).reshape(n, F)

    # feature MLP fused with the hoisted layer-0 input projection
    zf0, zb0 = feature_and_proj0(xt, p)                              # (n, 4H) x2
    yf0, yb0 = bilstm_recurrence(zf0.reshape(T, B, 4 * H),
                                 zb0.reshape(T, B, 4 * H), p["whh0"], H)
    # TODO(synk): nn.LSTM inter-layer dropout (p=0.3) and nn.Dropout are identity in
    # eval mode; omitted (inference semantics).
    zf1, zb1 = layer1_proj(yf0.reshape(n, H), yb0.reshape(n, H), p)  # (n, 4H) x2
    yf1, yb1 = bilstm_recurrence(zf1.reshape(T, B, 4 * H),
                                 zb1.reshape(T, B, 4 * H), p["whh1"], H)
    return attention_and_head(yf1, yb1, p)                           # (B, 1)


# ---------------------------------------------------------------------------
# Parameters (fused / transposed layout; comments give the torch correspondence).
# Gate columns are packed (i, f, o, g); a torch converter would permute from (i,f,g,o).
# ---------------------------------------------------------------------------
def init_params(key, H, input_size=16, n_heads=4):
    ks = iter(jax.random.split(key, 40))

    def w(shape, scale=0.1):
        return (scale * jax.random.normal(next(ks), shape)).astype(jnp.float32)

    p = {}
    # feature_extraction: Linear(16,H) -> LN -> ReLU -> [Drop] -> Linear(H,H) -> LN -> ReLU -> [Drop]
    p["w_fe1"], p["b_fe1"] = w((input_size, H)), w((1, H))
    p["g_fe1"], p["be_fe1"] = jnp.ones((1, H), jnp.float32), jnp.zeros((1, H), jnp.float32)
    p["w_fe2"], p["b_fe2"] = w((H, H)), w((1, H))
    p["g_fe2"], p["be_fe2"] = jnp.ones((1, H), jnp.float32), jnp.zeros((1, H), jnp.float32)
    # LSTM layer 0: wih0{f,b} = weight_ih_l0{,_reverse}.T (H,4H); b0{f,b} = bias_ih + bias_hh.
    p["wih0f"], p["wih0b"] = w((H, 4 * H)), w((H, 4 * H))
    p["b0f"], p["b0b"] = w((1, 4 * H)), w((1, 4 * H))
    p["whh0"] = w((2, H, 4 * H))        # [fwd, bwd] = weight_hh_l0{,_reverse}.T
    # LSTM layer 1: weight_ih_l1 (4H,2H) acts on [h_fwd | h_bwd]; split into the
    # fwd/bwd input halves so the concat is never materialized.
    p["wih1_ff"], p["wih1_fb"] = w((H, 4 * H)), w((H, 4 * H))   # -> fwd-direction gates
    p["wih1_bf"], p["wih1_bb"] = w((H, 4 * H)), w((H, 4 * H))   # -> bwd-direction gates
    p["b1f"], p["b1b"] = w((1, 4 * H)), w((1, 4 * H))
    p["whh1"] = w((2, H, 4 * H))
    # 4 attention heads: Linear(2H,H) -> Tanh -> Linear(H,1); heads packed on lanes,
    # the 2H input split into fwd/bwd halves, second linear block-diagonal.
    p["wa1f"], p["wa1b"] = w((H, n_heads * H)), w((H, n_heads * H))
    p["ba1"] = w((1, n_heads * H))
    wa2 = w((n_heads, H))               # each head's Linear(H,1) weight
    wsc = jnp.zeros((n_heads * H, n_heads), jnp.float32)
    for k in range(n_heads):
        wsc = wsc.at[k * H:(k + 1) * H, k].set(wa2[k])
    p["wsc"] = wsc
    p["ba2"] = w((1, n_heads))
    # output head: fc1(8H,H) -> LN -> ReLU -> fc2(H,H/2) -> LN -> ReLU -> fc3(H/2,1)
    p["wf1"], p["bf1"] = w((8 * H, H)), w((1, H))
    p["g1"], p["be1"] = jnp.ones((1, H), jnp.float32), jnp.zeros((1, H), jnp.float32)
    p["wf2"], p["bf2"] = w((H, H // 2)), w((1, H // 2))
    p["g2"], p["be2"] = jnp.ones((1, H // 2), jnp.float32), jnp.zeros((1, H // 2), jnp.float32)
    p["wf3"], p["bf3"] = w((1, H // 2)), w((1, 1))
    return p


if __name__ == "__main__":
    H = 32        # hidden_size (small demo; module default 128 — keep H a multiple of
                  # 128 in production so gate/lane slices are 128-lane aligned)
    B, T, F = 2, 8, 16
    key = jax.random.PRNGKey(0)
    pkey, xkey = jax.random.split(key)
    params = init_params(pkey, H)
    x = jax.random.normal(xkey, (B, T, F), dtype=jnp.float32)

    out = jax.jit(lstm_ensemble_forward)(x, params)
    out = jax.block_until_ready(out)
    assert out.shape == (B, 1) and out.dtype == jnp.float32
    print("KERNEL_OK")
</pallas_src>

<mosaic_0001>
module attributes {stable_mosaic.version = 11 : i64} {
  func.func @_feat_proj0_kernel(%arg0: i32, %arg1: memref<16x16xf32, #tpu.memory_space<vmem>>, %arg2: memref<16x32xbf16, #tpu.memory_space<vmem>>, %arg3: memref<1x32xf32, #tpu.memory_space<vmem>>, %arg4: memref<1x32xf32, #tpu.memory_space<vmem>>, %arg5: memref<1x32xf32, #tpu.memory_space<vmem>>, %arg6: memref<32x32xbf16, #tpu.memory_space<vmem>>, %arg7: memref<1x32xf32, #tpu.memory_space<vmem>>, %arg8: memref<1x32xf32, #tpu.memory_space<vmem>>, %arg9: memref<1x32xf32, #tpu.memory_space<vmem>>, %arg10: memref<32x128xbf16, #tpu.memory_space<vmem>>, %arg11: memref<1x128xf32, #tpu.memory_space<vmem>>, %arg12: memref<32x128xbf16, #tpu.memory_space<vmem>>, %arg13: memref<1x128xf32, #tpu.memory_space<vmem>>, %arg14: memref<16x128xf32, #tpu.memory_space<vmem>>, %arg15: memref<16x128xf32, #tpu.memory_space<vmem>>) attributes {dimension_semantics = [#tpu.dimension_semantics<parallel>], iteration_bounds = array<i64: 1>, scalar_prefetch = 0 : i64, scratch_operands = 0 : i64, tpu.core_type = #tpu.core_type<tc>, window_params = [{transform_indices = @transform_0, window_bounds = array<i64: 16, 16>}, {pipeline_mode = #tpu.pipeline_mode<synchronous>, transform_indices = @transform_1, window_bounds = array<i64: 16, 32>}, {pipeline_mode = #tpu.pipeline_mode<synchronous>, transform_indices = @transform_2, window_bounds = array<i64: 1, 32>}, {pipeline_mode = #tpu.pipeline_mode<synchronous>, transform_indices = @transform_3, window_bounds = array<i64: 1, 32>}, {pipeline_mode = #tpu.pipeline_mode<synchronous>, transform_indices = @transform_4, window_bounds = array<i64: 1, 32>}, {pipeline_mode = #tpu.pipeline_mode<synchronous>, transform_indices = @transform_5, window_bounds = array<i64: 32, 32>}, {pipeline_mode = #tpu.pipeline_mode<synchronous>, transform_indices = @transform_6, window_bounds = array<i64: 1, 32>}, {pipeline_mode = #tpu.pipeline_mode<synchronous>, transform_indices = @transform_7, window_bounds = array<i64: 1, 32>}, {pipeline_mode = #tpu.pipeline_mode<synchronous>, transform_indices = @transform_8, window_bounds = array<i64: 1, 32>}, {pipeline_mode = #tpu.pipeline_mode<synchronous>, transform_indices = @transform_9, window_bounds = array<i64: 32, 128>}, {pipeline_mode = #tpu.pipeline_mode<synchronous>, transform_indices = @transform_10, window_bounds = array<i64: 1, 128>}, {pipeline_mode = #tpu.pipeline_mode<synchronous>, transform_indices = @transform_11, window_bounds = array<i64: 32, 128>}, {pipeline_mode = #tpu.pipeline_mode<synchronous>, transform_indices = @transform_12, window_bounds = array<i64: 1, 128>}, {transform_indices = @transform_13, window_bounds = array<i64: 16, 128>}, {transform_indices = @transform_14, window_bounds = array<i64: 16, 128>}]} {
    %c0 = arith.constant 0 : index
    %c0_0 = arith.constant 0 : index
    %0 = vector.load %arg1[%c0, %c0_0] : memref<16x16xf32, #tpu.memory_space<vmem>>, vector<16x16xf32>
    %1 = arith.truncf %0 : vector<16x16xf32> to vector<16x16xbf16>
    %c0_1 = arith.constant 0 : index
    %c0_2 = arith.constant 0 : index
    %2 = vector.load %arg2[%c0_1, %c0_2] : memref<16x32xbf16, #tpu.memory_space<vmem>>, vector<16x32xbf16>
    %cst = arith.constant dense<0.000000e+00> : vector<16x32xf32>
    %3 = tpu.matmul %1, %2, %cst {dimension_numbers = #tpu.dot_dimension_numbers<[1], [0], [0], [1], [0, 0, 1, 1], [], []>} : vector<16x16xbf16>, vector<16x32xbf16>, vector<16x32xf32> -> vector<16x32xf32>
    %c0_3 = arith.constant 0 : index
    %c0_4 = arith.constant 0 : index
    %4 = vector.load %arg3[%c0_3, %c0_4] : memref<1x32xf32, #tpu.memory_space<vmem>>, vector<1x32xf32>
    %5 = vector.broadcast %4 : vector<1x32xf32> to vector<16x32xf32>
    %6 = arith.addf %3, %5 : vector<16x32xf32>
    %c0_5 = arith.constant 0 : index
    %c0_6 = arith.constant 0 : index
    %7 = vector.load %arg4[%c0_5, %c0_6] : memref<1x32xf32, #tpu.memory_space<vmem>>, vector<1x32xf32>
    %c0_7 = arith.constant 0 : index
    %c0_8 = arith.constant 0 : index
    %8 = vector.load %arg5[%c0_7, %c0_8] : memref<1x32xf32, #tpu.memory_space<vmem>>, vector<1x32xf32>
    %cst_9 = arith.constant dense<0.000000e+00> : vector<16xf32>
    %9 = vector.multi_reduction <add>, %6, %cst_9 [1] : vector<16x32xf32> to vector<16xf32>
    %10 = vector.shape_cast %9 : vector<16xf32> to vector<16x1xf32>
    %cst_10 = arith.constant 3.200000e+01 : f32
    %11 = vector.broadcast %cst_10 : f32 to vector<16x1xf32>
    %12 = arith.divf %10, %11 : vector<16x1xf32>
    %13 = vector.broadcast %12 : vector<16x1xf32> to vector<16x32xf32>
    %14 = arith.subf %6, %13 : vector<16x32xf32>
    %15 = arith.mulf %14, %14 : vector<16x32xf32>
    %cst_11 = arith.constant dense<0.000000e+00> : vector<16xf32>
    %16 = vector.multi_reduction <add>, %15, %cst_11 [1] : vector<16x32xf32> to vector<16xf32>
    %17 = vector.shape_cast %16 : vector<16xf32> to vector<16x1xf32>
    %cst_12 = arith.constant 3.200000e+01 : f32
    %18 = vector.broadcast %cst_12 : f32 to vector<16x1xf32>
    %19 = arith.divf %17, %18 : vector<16x1xf32>
    %20 = vector.broadcast %12 : vector<16x1xf32> to vector<16x32xf32>
    %21 = arith.subf %6, %20 : vector<16x32xf32>
    %cst_13 = arith.constant 9.99999974E-6 : f32
    %22 = vector.broadcast %cst_13 : f32 to vector<16x1xf32>
    %23 = arith.addf %19, %22 : vector<16x1xf32>
    %24 = math.rsqrt %23 : vector<16x1xf32>
    %25 = vector.broadcast %24 : vector<16x1xf32> to vector<16x32xf32>
    %26 = arith.mulf %21, %25 : vector<16x32xf32>
    %27 = vector.broadcast %7 : vector<1x32xf32> to vector<16x32xf32>
    %28 = arith.mulf %26, %27 : vector<16x32xf32>
    %29 = vector.broadcast %8 : vector<1x32xf32> to vector<16x32xf32>
    %30 = arith.addf %28, %29 : vector<16x32xf32>
    %cst_14 = arith.constant 0.000000e+00 : f32
    %31 = vector.broadcast %cst_14 : f32 to vector<16x32xf32>
    %32 = arith.maximumf %30, %31 : vector<16x32xf32>
    %33 = arith.truncf %32 : vector<16x32xf32> to vector<16x32xbf16>
    %c0_15 = arith.constant 0 : index
    %c0_16 = arith.constant 0 : index
    %34 = vector.load %arg6[%c0_15, %c0_16] : memref<32x32xbf16, #tpu.memory_space<vmem>>, vector<32x32xbf16>
    %cst_17 = arith.constant dense<0.000000e+00> : vector<16x32xf32>
    %35 = tpu.matmul %33, %34, %cst_17 {dimension_numbers = #tpu.dot_dimension_numbers<[1], [0], [0], [1], [0, 0, 1, 1], [], []>} : vector<16x32xbf16>, vector<32x32xbf16>, vector<16x32xf32> -> vector<16x32xf32>
    %c0_18 = arith.constant 0 : index
    %c0_19 = arith.constant 0 : index
    %36 = vector.load %arg7[%c0_18, %c0_19] : memref<1x32xf32, #tpu.memory_space<vmem>>, vector<1x32xf32>
    %37 = vector.broadcast %36 : vector<1x32xf32> to vector<16x32xf32>
    %38 = arith.addf %35, %37 : vector<16x32xf32>
    %c0_20 = arith.constant 0 : index
    %c0_21 = arith.constant 0 : index
    %39 = vector.load %arg8[%c0_20, %c0_21] : memref<1x32xf32, #tpu.memory_space<vmem>>, vector<1x32xf32>
    %c0_22 = arith.constant 0 : index
    %c0_23 = arith.constant 0 : index
    %40 = vector.load %arg9[%c0_22, %c0_23] : memref<1x32xf32, #tpu.memory_space<vmem>>, vector<1x32xf32>
    %cst_24 = arith.constant dense<0.000000e+00> : vector<16xf32>
    %41 = vector.multi_reduction <add>, %38, %cst_24 [1] : vector<16x32xf32> to vector<16xf32>
    %42 = vector.shape_cast %41 : vector<16xf32> to vector<16x1xf32>
    %cst_25 = arith.constant 3.200000e+01 : f32
    %43 = vector.broadcast %cst_25 : f32 to vector<16x1xf32>
    %44 = arith.divf %42, %43 : vector<16x1xf32>
    %45 = vector.broadcast %44 : vector<16x1xf32> to vector<16x32xf32>
    %46 = arith.subf %38, %45 : vector<16x32xf32>
    %47 = arith.mulf %46, %46 : vector<16x32xf32>
    %cst_26 = arith.constant dense<0.000000e+00> : vector<16xf32>
    %48 = vector.multi_reduction <add>, %47, %cst_26 [1] : vector<16x32xf32> to vector<16xf32>
    %49 = vector.shape_cast %48 : vector<16xf32> to vector<16x1xf32>
    %cst_27 = arith.constant 3.200000e+01 : f32
    %50 = vector.broadcast %cst_27 : f32 to vector<16x1xf32>
    %51 = arith.divf %49, %50 : vector<16x1xf32>
    %52 = vector.broadcast %44 : vector<16x1xf32> to vector<16x32xf32>
    %53 = arith.subf %38, %52 : vector<16x32xf32>
    %cst_28 = arith.constant 9.99999974E-6 : f32
    %54 = vector.broadcast %cst_28 : f32 to vector<16x1xf32>
    %55 = arith.addf %51, %54 : vector<16x1xf32>
    %56 = math.rsqrt %55 : vector<16x1xf32>
    %57 = vector.broadcast %56 : vector<16x1xf32> to vector<16x32xf32>
    %58 = arith.mulf %53, %57 : vector<16x32xf32>
    %59 = vector.broadcast %39 : vector<1x32xf32> to vector<16x32xf32>
    %60 = arith.mulf %58, %59 : vector<16x32xf32>
    %61 = vector.broadcast %40 : vector<1x32xf32> to vector<16x32xf32>
    %62 = arith.addf %60, %61 : vector<16x32xf32>
    %cst_29 = arith.constant 0.000000e+00 : f32
    %63 = vector.broadcast %cst_29 : f32 to vector<16x32xf32>
    %64 = arith.maximumf %62, %63 : vector<16x32xf32>
    %65 = arith.truncf %64 : vector<16x32xf32> to vector<16x32xbf16>
    %c0_30 = arith.constant 0 : index
    %c0_31 = arith.constant 0 : index
    %66 = vector.load %arg10[%c0_30, %c0_31] : memref<32x128xbf16, #tpu.memory_space<vmem>>, vector<32x128xbf16>
    %cst_32 = arith.constant dense<0.000000e+00> : vector<16x128xf32>
    %67 = tpu.matmul %65, %66, %cst_32 {dimension_numbers = #tpu.dot_dimension_numbers<[1], [0], [0], [1], [0, 0, 1, 1], [], []>} : vector<16x32xbf16>, vector<32x128xbf16>, vector<16x128xf32> -> vector<16x128xf32>
    %c0_33 = arith.constant 0 : index
    %c0_34 = arith.constant 0 : index
    %68 = vector.load %arg11[%c0_33, %c0_34] : memref<1x128xf32, #tpu.memory_space<vmem>>, vector<1x128xf32>
    %69 = vector.broadcast %68 : vector<1x128xf32> to vector<16x128xf32>
    %70 = arith.addf %67, %69 : vector<16x128xf32>
    %c0_35 = arith.constant 0 : index
    %c0_36 = arith.constant 0 : index
    %71 = vector.load %arg14[%c0_35, %c0_36] : memref<16x128xf32, #tpu.memory_space<vmem>>, vector<16x128xf32>
    tpu.vector_store %arg14[%c0_35, %c0_36], %70 {strides = array<i32>} : memref<16x128xf32, #tpu.memory_space<vmem>>, vector<16x128xf32>,
    %c0_37 = arith.constant 0 : index
    %c0_38 = arith.constant 0 : index
    %72 = vector.load %arg12[%c0_37, %c0_38] : memref<32x128xbf16, #tpu.memory_space<vmem>>, vector<32x128xbf16>
    %cst_39 = arith.constant dense<0.000000e+00> : vector<16x128xf32>
    %73 = tpu.matmul %65, %72, %cst_39 {dimension_numbers = #tpu.dot_dimension_numbers<[1], [0], [0], [1], [0, 0, 1, 1], [], []>} : vector<16x32xbf16>, vector<32x128xbf16>, vector<16x128xf32> -> vector<16x128xf32>
    %c0_40 = arith.constant 0 : index
    %c0_41 = arith.constant 0 : index
    %74 = vector.load %arg13[%c0_40, %c0_41] : memref<1x128xf32, #tpu.memory_space<vmem>>, vector<1x128xf32>
    %75 = vector.broadcast %74 : vector<1x128xf32> to vector<16x128xf32>
    %76 = arith.addf %73, %75 : vector<16x128xf32>
    %c0_42 = arith.constant 0 : index
    %c0_43 = arith.constant 0 : index
    %77 = vector.load %arg15[%c0_42, %c0_43] : memref<16x128xf32, #tpu.memory_space<vmem>>, vector<16x128xf32>
    tpu.vector_store %arg15[%c0_42, %c0_43], %76 {strides = array<i32>} : memref<16x128xf32, #tpu.memory_space<vmem>>, vector<16x128xf32>,
    return
  }
  func.func @transform_0(%arg0: i32) -> (i32, i32) {
    %c0_i32 = arith.constant 0 : i32
    %c0_i32_0 = arith.constant 0 : i32
    return %arg0, %c0_i32 : i32, i32
  }
  func.func @transform_1(%arg0: i32) -> (i32, i32) {
    %c0_i32 = arith.constant 0 : i32
    %c0_i32_0 = arith.constant 0 : i32
    %c0_i32_1 = arith.constant 0 : i32
    return %c0_i32, %c0_i32_0 : i32, i32
  }
  func.func @transform_2(%arg0: i32) -> (i32, i32) {
    %c0_i32 = arith.constant 0 : i32
    %c0_i32_0 = arith.constant 0 : i32
    %c0_i32_1 = arith.constant 0 : i32
    return %c0_i32, %c0_i32_0 : i32, i32
  }
  func.func @transform_3(%arg0: i32) -> (i32, i32) {
    %c0_i32 = arith.constant 0 : i32
    %c0_i32_0 = arith.constant 0 : i32
    %c0_i32_1 = arith.constant 0 : i32
    return %c0_i32, %c0_i32_0 : i32, i32
  }
  func.func @transform_4(%arg0: i32) -> (i32, i32) {
    %c0_i32 = arith.constant 0 : i32
    %c0_i32_0 = arith.constant 0 : i32
    %c0_i32_1 = arith.constant 0 : i32
    return %c0_i32, %c0_i32_0 : i32, i32
  }
  func.func @transform_5(%arg0: i32) -> (i32, i32) {
    %c0_i32 = arith.constant 0 : i32
    %c0_i32_0 = arith.constant 0 : i32
    %c0_i32_1 = arith.constant 0 : i32
    return %c0_i32, %c0_i32_0 : i32, i32
  }
  func.func @transform_6(%arg0: i32) -> (i32, i32) {
    %c0_i32 = arith.constant 0 : i32
    %c0_i32_0 = arith.constant 0 : i32
    %c0_i32_1 = arith.constant 0 : i32
    return %c0_i32, %c0_i32_0 : i32, i32
  }
  func.func @transform_7(%arg0: i32) -> (i32, i32) {
    %c0_i32 = arith.constant 0 : i32
    %c0_i32_0 = arith.constant 0 : i32
    %c0_i32_1 = arith.constant 0 : i32
    return %c0_i32, %c0_i32_0 : i32, i32
  }
  func.func @transform_8(%arg0: i32) -> (i32, i32) {
    %c0_i32 = arith.constant 0 : i32
    %c0_i32_0 = arith.constant 0 : i32
    %c0_i32_1 = arith.constant 0 : i32
    return %c0_i32, %c0_i32_0 : i32, i32
  }
  func.func @transform_9(%arg0: i32) -> (i32, i32) {
    %c0_i32 = arith.constant 0 : i32
    %c0_i32_0 = arith.constant 0 : i32
    %c0_i32_1 = arith.constant 0 : i32
    return %c0_i32, %c0_i32_0 : i32, i32
  }
  func.func @transform_10(%arg0: i32) -> (i32, i32) {
    %c0_i32 = arith.constant 0 : i32
    %c0_i32_0 = arith.constant 0 : i32
    %c0_i32_1 = arith.constant 0 : i32
    return %c0_i32, %c0_i32_0 : i32, i32
  }
  func.func @transform_11(%arg0: i32) -> (i32, i32) {
    %c0_i32 = arith.constant 0 : i32
    %c0_i32_0 = arith.constant 0 : i32
    %c0_i32_1 = arith.constant 0 : i32
    return %c0_i32, %c0_i32_0 : i32, i32
  }
  func.func @transform_12(%arg0: i32) -> (i32, i32) {
    %c0_i32 = arith.constant 0 : i32
    %c0_i32_0 = arith.constant 0 : i32
    %c0_i32_1 = arith.constant 0 : i32
    return %c0_i32, %c0_i32_0 : i32, i32
  }
  func.func @transform_13(%arg0: i32) -> (i32, i32) {
    %c0_i32 = arith.constant 0 : i32
    %c0_i32_0 = arith.constant 0 : i32
    return %arg0, %c0_i32 : i32, i32
  }
  func.func @transform_14(%arg0: i32) -> (i32, i32) {
    %c0_i32 = arith.constant 0 : i32
    %c0_i32_0 = arith.constant 0 : i32
    return %arg0, %c0_i32 : i32, i32
  }
}

module attributes {stable_mosaic.version = 11 : i64} {
  func.func @_bilstm_rec_kernel(%arg0: i32, %arg1: memref<8x2x128xf32, #tpu.memory_space<vmem>>, %arg2: memref<8x2x128xf32, #tpu.memory_space<vmem>>, %arg3: memref<2x32x128xbf16, #tpu.memory_space<vmem>>, %arg4: memref<8x2x32xf32, #tpu.memory_space<vmem>>, %arg5: memref<8x2x32xf32, #tpu.memory_space<vmem>>, %arg6: memref<2x32xf32, #tpu.memory_space<vmem>>, %arg7: memref<2x32xf32, #tpu.memory_space<vmem>>, %arg8: memref<2x32xf32, #tpu.memory_space<vmem>>, %arg9: memref<2x32xf32, #tpu.memory_space<vmem>>) attributes {dimension_semantics = [#tpu.dimension_semantics<arbitrary>], iteration_bounds = array<i64: 1>, scalar_prefetch = 0 : i64, scratch_operands = 4 : i64, tpu.core_type = #tpu.core_type<tc>, window_params = [{transform_indices = @transform_0, window_bounds = array<i64: 8, 2, 128>}, {transform_indices = @transform_1, window_bounds = array<i64: 8, 2, 128>}, {pipeline_mode = #tpu.pipeline_mode<synchronous>, transform_indices = @transform_2, window_bounds = array<i64: 2, 32, 128>}, {transform_indices = @transform_3, window_bounds = array<i64: 8, 2, 32>}, {transform_indices = @transform_4, window_bounds = array<i64: 8, 2, 32>}]} {
    %c0_i32 = arith.constant 0 : i32
    %0 = arith.cmpi eq, %arg0, %c0_i32 : i32
    %1 = arith.extui %0 : i1 to i32
    %c0_i32_0 = arith.constant 0 : i32
    %2 = arith.cmpi ne, %1, %c0_i32_0 : i32
    scf.if %2 {
      %cst = arith.constant 0.000000e+00 : f32
      %17 = vector.broadcast %cst : f32 to vector<2x32xf32>
      %c0_23 = arith.constant 0 : index
      %c0_24 = arith.constant 0 : index
      %18 = vector.load %arg6[%c0_23, %c0_24] : memref<2x32xf32, #tpu.memory_space<vmem>>, vector<2x32xf32>
      tpu.vector_store %arg6[%c0_23, %c0_24], %17 {strides = array<i32>} : memref<2x32xf32, #tpu.memory_space<vmem>>, vector<2x32xf32>,
      %cst_25 = arith.constant 0.000000e+00 : f32
      %19 = vector.broadcast %cst_25 : f32 to vector<2x32xf32>
      %c0_26 = arith.constant 0 : index
      %c0_27 = arith.constant 0 : index
      %20 = vector.load %arg7[%c0_26, %c0_27] : memref<2x32xf32, #tpu.memory_space<vmem>>, vector<2x32xf32>
      tpu.vector_store %arg7[%c0_26, %c0_27], %19 {strides = array<i32>} : memref<2x32xf32, #tpu.memory_space<vmem>>, vector<2x32xf32>,
      %cst_28 = arith.constant 0.000000e+00 : f32
      %21 = vector.broadcast %cst_28 : f32 to vector<2x32xf32>
      %c0_29 = arith.constant 0 : index
      %c0_30 = arith.constant 0 : index
      %22 = vector.load %arg8[%c0_29, %c0_30] : memref<2x32xf32, #tpu.memory_space<vmem>>, vector<2x32xf32>
      tpu.vector_store %arg8[%c0_29, %c0_30], %21 {strides = array<i32>} : memref<2x32xf32, #tpu.memory_space<vmem>>, vector<2x32xf32>,
      %cst_31 = arith.constant 0.000000e+00 : f32
      %23 = vector.broadcast %cst_31 : f32 to vector<2x32xf32>
      %c0_32 = arith.constant 0 : index
      %c0_33 = arith.constant 0 : index
      %24 = vector.load %arg9[%c0_32, %c0_33] : memref<2x32xf32, #tpu.memory_space<vmem>>, vector<2x32xf32>
      tpu.vector_store %arg9[%c0_32, %c0_33], %23 {strides = array<i32>} : memref<2x32xf32, #tpu.memory_space<vmem>>, vector<2x32xf32>,
    } else {
    }
    %c0 = arith.constant 0 : index
    %c0_1 = arith.constant 0 : index
    %c0_2 = arith.constant 0 : index
    %3 = vector.load %arg3[%c0, %c0_1, %c0_2] : memref<2x32x128xbf16, #tpu.memory_space<vmem>>, vector<1x32x128xbf16>
    %4 = vector.shape_cast %3 : vector<1x32x128xbf16> to vector<32x128xbf16>
    %c1 = arith.constant 1 : index
    %c0_3 = arith.constant 0 : index
    %c0_4 = arith.constant 0 : index
    %5 = vector.load %arg3[%c1, %c0_3, %c0_4] : memref<2x32x128xbf16, #tpu.memory_space<vmem>>, vector<1x32x128xbf16>
    %6 = vector.shape_cast %5 : vector<1x32x128xbf16> to vector<32x128xbf16>
    %c0_5 = arith.constant 0 : index
    %c0_6 = arith.constant 0 : index
    %7 = vector.load %arg6[%c0_5, %c0_6] : memref<2x32xf32, #tpu.memory_space<vmem>>, vector<2x32xf32>
    %c0_7 = arith.constant 0 : index
    %c0_8 = arith.constant 0 : index
    %8 = vector.load %arg7[%c0_7, %c0_8] : memref<2x32xf32, #tpu.memory_space<vmem>>, vector<2x32xf32>
    %c0_9 = arith.constant 0 : index
    %c0_10 = arith.constant 0 : index
    %9 = vector.load %arg8[%c0_9, %c0_10] : memref<2x32xf32, #tpu.memory_space<vmem>>, vector<2x32xf32>
    %c0_11 = arith.constant 0 : index
    %c0_12 = arith.constant 0 : index
    %10 = vector.load %arg9[%c0_11, %c0_12] : memref<2x32xf32, #tpu.memory_space<vmem>>, vector<2x32xf32>
    %c0_i32_13 = arith.constant 0 : i32
    %c8_i32 = arith.constant 8 : i32
    %11 = arith.addi %c0_i32_13, %c8_i32 : i32
    %c1_i32 = arith.constant 1 : i32
    %12:4 = scf.for %arg10 = %c0_i32_13 to %11 step %c1_i32 iter_args(%arg11 = %7, %arg12 = %8, %arg13 = %9, %arg14 = %10) -> (vector<2x32xf32>, vector<2x32xf32>, vector<2x32xf32>, vector<2x32xf32>)  : i32 {
      %c7_i32 = arith.constant 7 : i32
      %17 = arith.subi %c7_i32, %arg10 : i32
      %18 = arith.index_cast %arg10 : i32 to index
      %c0_23 = arith.constant 0 : index
      %c0_24 = arith.constant 0 : index
      %19 = vector.load %arg1[%18, %c0_23, %c0_24] : memref<8x2x128xf32, #tpu.memory_space<vmem>>, vector<1x2x128xf32>
      %20 = vector.shape_cast %19 : vector<1x2x128xf32> to vector<2x128xf32>
      %21 = arith.truncf %arg11 : vector<2x32xf32> to vector<2x32xbf16>
      %cst = arith.constant dense<0.000000e+00> : vector<2x128xf32>
      %22 = tpu.matmul %21, %4, %cst {dimension_numbers = #tpu.dot_dimension_numbers<[1], [0], [0], [1], [0, 0, 1, 1], [], []>} : vector<2x32xbf16>, vector<32x128xbf16>, vector<2x128xf32> -> vector<2x128xf32>
      %23 = arith.addf %20, %22 : vector<2x128xf32>
      %24 = arith.index_cast %17 : i32 to index
      %c0_25 = arith.constant 0 : index
      %c0_26 = arith.constant 0 : index
      %25 = vector.load %arg2[%24, %c0_25, %c0_26] : memref<8x2x128xf32, #tpu.memory_space<vmem>>, vector<1x2x128xf32>
      %26 = vector.shape_cast %25 : vector<1x2x128xf32> to vector<2x128xf32>
      %27 = arith.truncf %arg13 : vector<2x32xf32> to vector<2x32xbf16>
      %cst_27 = arith.constant dense<0.000000e+00> : vector<2x128xf32>
      %28 = tpu.matmul %27, %6, %cst_27 {dimension_numbers = #tpu.dot_dimension_numbers<[1], [0], [0], [1], [0, 0, 1, 1], [], []>} : vector<2x32xbf16>, vector<32x128xbf16>, vector<2x128xf32> -> vector<2x128xf32>
      %29 = arith.addf %26, %28 : vector<2x128xf32>
      %30 = vector.extract_strided_slice %23 {offsets = [0, 0], sizes = [2, 96], strides = [1, 1]} : vector<2x128xf32> to vector<2x96xf32>
      %31 = arith.negf %30 : vector<2x96xf32>
      %32 = math.exp %31 : vector<2x96xf32>
      %cst_28 = arith.constant 1.000000e+00 : f32
      %33 = vector.broadcast %cst_28 : f32 to vector<2x96xf32>
      %34 = arith.addf %33, %32 : vector<2x96xf32>
      %35 = arith.divf %33, %34 : vector<2x96xf32>
      %36 = vector.extract_strided_slice %35 {offsets = [0, 0], sizes = [2, 32], strides = [1, 1]} : vector<2x96xf32> to vector<2x32xf32>
      %37 = vector.extract_strided_slice %35 {offsets = [0, 32], sizes = [2, 32], strides = [1, 1]} : vector<2x96xf32> to vector<2x32xf32>
      %38 = vector.extract_strided_slice %35 {offsets = [0, 64], sizes = [2, 32], strides = [1, 1]} : vector<2x96xf32> to vector<2x32xf32>
      %39 = vector.extract_strided_slice %23 {offsets = [0, 96], sizes = [2, 32], strides = [1, 1]} : vector<2x128xf32> to vector<2x32xf32>
      %40 = math.tanh %39 : vector<2x32xf32>
      %41 = arith.mulf %37, %arg12 : vector<2x32xf32>
      %42 = arith.mulf %36, %40 : vector<2x32xf32>
      %43 = arith.addf %41, %42 : vector<2x32xf32>
      %44 = math.tanh %43 : vector<2x32xf32>
      %45 = arith.mulf %38, %44 : vector<2x32xf32>
      %46 = vector.extract_strided_slice %29 {offsets = [0, 0], sizes = [2, 96], strides = [1, 1]} : vector<2x128xf32> to vector<2x96xf32>
      %47 = arith.negf %46 : vector<2x96xf32>
      %48 = math.exp %47 : vector<2x96xf32>
      %cst_29 = arith.constant 1.000000e+00 : f32
      %49 = vector.broadcast %cst_29 : f32 to vector<2x96xf32>
      %50 = arith.addf %49, %48 : vector<2x96xf32>
      %51 = arith.divf %49, %50 : vector<2x96xf32>
      %52 = vector.extract_strided_slice %51 {offsets = [0, 0], sizes = [2, 32], strides = [1, 1]} : vector<2x96xf32> to vector<2x32xf32>
      %53 = vector.extract_strided_slice %51 {offsets = [0, 32], sizes = [2, 32], strides = [1, 1]} : vector<2x96xf32> to vector<2x32xf32>
      %54 = vector.extract_strided_slice %51 {offsets = [0, 64], sizes = [2, 32], strides = [1, 1]} : vector<2x96xf32> to vector<2x32xf32>
      %55 = vector.extract_strided_slice %29 {offsets = [0, 96], sizes = [2, 32], strides = [1, 1]} : vector<2x128xf32> to vector<2x32xf32>
      %56 = math.tanh %55 : vector<2x32xf32>
      %57 = arith.mulf %53, %arg14 : vector<2x32xf32>
      %58 = arith.mulf %52, %56 : vector<2x32xf32>
      %59 = arith.addf %57, %58 : vector<2x32xf32>
      %60 = math.tanh %59 : vector<2x32xf32>
      %61 = arith.mulf %54, %60 : vector<2x32xf32>
      %62 = arith.index_cast %arg10 : i32 to index
      %c0_30 = arith.constant 0 : index
      %c0_31 = arith.constant 0 : index
      %63 = vector.load %arg4[%62, %c0_30, %c0_31] : memref<8x2x32xf32, #tpu.memory_space<vmem>>, vector<1x2x32xf32>
      %64 = vector.shape_cast %63 : vector<1x2x32xf32> to vector<2x32xf32>
      %65 = vector.shape_cast %45 : vector<2x32xf32> to vector<1x2x32xf32>
      tpu.vector_store %arg4[%62, %c0_30, %c0_31], %65 {strides = array<i32>} : memref<8x2x32xf32, #tpu.memory_space<vmem>>, vector<1x2x32xf32>,
      %66 = arith.index_cast %17 : i32 to index
      %c0_32 = arith.constant 0 : index
      %c0_33 = arith.constant 0 : index
      %67 = vector.load %arg5[%66, %c0_32, %c0_33] : memref<8x2x32xf32, #tpu.memory_space<vmem>>, vector<1x2x32xf32>
      %68 = vector.shape_cast %67 : vector<1x2x32xf32> to vector<2x32xf32>
      %69 = vector.shape_cast %61 : vector<2x32xf32> to vector<1x2x32xf32>
      tpu.vector_store %arg5[%66, %c0_32, %c0_33], %69 {strides = array<i32>} : memref<8x2x32xf32, #tpu.memory_space<vmem>>, vector<1x2x32xf32>,
      scf.yield %45, %43, %61, %59 : vector<2x32xf32>, vector<2x32xf32>, vector<2x32xf32>, vector<2x32xf32>
    }
    %c8_i32_14 = arith.constant 8 : i32
    %c0_15 = arith.constant 0 : index
    %c0_16 = arith.constant 0 : index
    %13 = vector.load %arg6[%c0_15, %c0_16] : memref<2x32xf32, #tpu.memory_space<vmem>>, vector<2x32xf32>
    tpu.vector_store %arg6[%c0_15, %c0_16], %12#0 {strides = array<i32>} : memref<2x32xf32, #tpu.memory_space<vmem>>, vector<2x32xf32>,
    %c0_17 = arith.constant 0 : index
    %c0_18 = arith.constant 0 : index
    %14 = vector.load %arg7[%c0_17, %c0_18] : memref<2x32xf32, #tpu.memory_space<vmem>>, vector<2x32xf32>
    tpu.vector_store %arg7[%c0_17, %c0_18], %12#1 {strides = array<i32>} : memref<2x32xf32, #tpu.memory_space<vmem>>, vector<2x32xf32>,
    %c0_19 = arith.constant 0 : index
    %c0_20 = arith.constant 0 : index
    %15 = vector.load %arg8[%c0_19, %c0_20] : memref<2x32xf32, #tpu.memory_space<vmem>>, vector<2x32xf32>
    tpu.vector_store %arg8[%c0_19, %c0_20], %12#2 {strides = array<i32>} : memref<2x32xf32, #tpu.memory_space<vmem>>, vector<2x32xf32>,
    %c0_21 = arith.constant 0 : index
    %c0_22 = arith.constant 0 : index
    %16 = vector.load %arg9[%c0_21, %c0_22] : memref<2x32xf32, #tpu.memory_space<vmem>>, vector<2x32xf32>
    tpu.vector_store %arg9[%c0_21, %c0_22], %12#3 {strides = array<i32>} : memref<2x32xf32, #tpu.memory_space<vmem>>, vector<2x32xf32>,
    return
  }
  func.func @transform_0(%arg0: i32) -> (i32, i32, i32) {
    %c0_i32 = arith.constant 0 : i32
    %c0_i32_0 = arith.constant 0 : i32
    %c0_i32_1 = arith.constant 0 : i32
    return %arg0, %c0_i32, %c0_i32_0 : i32, i32, i32
  }
  func.func @transform_1(%arg0: i32) -> (i32, i32, i32) {
    %c0_i32 = arith.constant 0 : i32
    %0 = arith.subi %c0_i32, %arg0 : i32
    %c0_i32_0 = arith.constant 0 : i32
    %c0_i32_1 = arith.constant 0 : i32
    %c0_i32_2 = arith.constant 0 : i32
    return %0, %c0_i32_0, %c0_i32_1 : i32, i32, i32
  }
  func.func @transform_2(%arg0: i32) -> (i32, i32, i32) {
    %c0_i32 = arith.constant 0 : i32
    %c0_i32_0 = arith.constant 0 : i32
    %c0_i32_1 = arith.constant 0 : i32
    %c0_i32_2 = arith.constant 0 : i32
    return %c0_i32, %c0_i32_0, %c0_i32_1 : i32, i32, i32
  }
  func.func @transform_3(%arg0: i32) -> (i32, i32, i32) {
    %c0_i32 = arith.constant 0 : i32
    %c0_i32_0 = arith.constant 0 : i32
    %c0_i32_1 = arith.constant 0 : i32
    return %arg0, %c0_i32, %c0_i32_0 : i32, i32, i32
  }
  func.func @transform_4(%arg0: i32) -> (i32, i32, i32) {
    %c0_i32 = arith.constant 0 : i32
    %0 = arith.subi %c0_i32, %arg0 : i32
    %c0_i32_0 = arith.constant 0 : i32
    %c0_i32_1 = arith.constant 0 : i32
    %c0_i32_2 = arith.constant 0 : i32
    return %0, %c0_i32_0, %c0_i32_1 : i32, i32, i32
  }
}

module attributes {stable_mosaic.version = 11 : i64} {
  func.func @_proj1_kernel(%arg0: i32, %arg1: memref<16x32xf32, #tpu.memory_space<vmem>>, %arg2: memref<16x32xf32, #tpu.memory_space<vmem>>, %arg3: memref<32x128xbf16, #tpu.memory_space<vmem>>, %arg4: memref<32x128xbf16, #tpu.memory_space<vmem>>, %arg5: memref<1x128xf32, #tpu.memory_space<vmem>>, %arg6: memref<32x128xbf16, #tpu.memory_space<vmem>>, %arg7: memref<32x128xbf16, #tpu.memory_space<vmem>>, %arg8: memref<1x128xf32, #tpu.memory_space<vmem>>, %arg9: memref<16x128xf32, #tpu.memory_space<vmem>>, %arg10: memref<16x128xf32, #tpu.memory_space<vmem>>) attributes {dimension_semantics = [#tpu.dimension_semantics<parallel>], iteration_bounds = array<i64: 1>, scalar_prefetch = 0 : i64, scratch_operands = 0 : i64, tpu.core_type = #tpu.core_type<tc>, window_params = [{transform_indices = @transform_0, window_bounds = array<i64: 16, 32>}, {transform_indices = @transform_1, window_bounds = array<i64: 16, 32>}, {pipeline_mode = #tpu.pipeline_mode<synchronous>, transform_indices = @transform_2, window_bounds = array<i64: 32, 128>}, {pipeline_mode = #tpu.pipeline_mode<synchronous>, transform_indices = @transform_3, window_bounds = array<i64: 32, 128>}, {pipeline_mode = #tpu.pipeline_mode<synchronous>, transform_indices = @transform_4, window_bounds = array<i64: 1, 128>}, {pipeline_mode = #tpu.pipeline_mode<synchronous>, transform_indices = @transform_5, window_bounds = array<i64: 32, 128>}, {pipeline_mode = #tpu.pipeline_mode<synchronous>, transform_indices = @transform_6, window_bounds = array<i64: 32, 128>}, {pipeline_mode = #tpu.pipeline_mode<synchronous>, transform_indices = @transform_7, window_bounds = array<i64: 1, 128>}, {transform_indices = @transform_8, window_bounds = array<i64: 16, 128>}, {transform_indices = @transform_9, window_bounds = array<i64: 16, 128>}]} {
    %c0 = arith.constant 0 : index
    %c0_0 = arith.constant 0 : index
    %0 = vector.load %arg1[%c0, %c0_0] : memref<16x32xf32, #tpu.memory_space<vmem>>, vector<16x32xf32>
    %1 = arith.truncf %0 : vector<16x32xf32> to vector<16x32xbf16>
    %c0_1 = arith.constant 0 : index
    %c0_2 = arith.constant 0 : index
    %2 = vector.load %arg2[%c0_1, %c0_2] : memref<16x32xf32, #tpu.memory_space<vmem>>, vector<16x32xf32>
    %3 = arith.truncf %2 : vector<16x32xf32> to vector<16x32xbf16>
    %c0_3 = arith.constant 0 : index
    %c0_4 = arith.constant 0 : index
    %4 = vector.load %arg3[%c0_3, %c0_4] : memref<32x128xbf16, #tpu.memory_space<vmem>>, vector<32x128xbf16>
    %cst = arith.constant dense<0.000000e+00> : vector<16x128xf32>
    %5 = tpu.matmul %1, %4, %cst {dimension_numbers = #tpu.dot_dimension_numbers<[1], [0], [0], [1], [0, 0, 1, 1], [], []>} : vector<16x32xbf16>, vector<32x128xbf16>, vector<16x128xf32> -> vector<16x128xf32>
    %c0_5 = arith.constant 0 : index
    %c0_6 = arith.constant 0 : index
    %6 = vector.load %arg4[%c0_5, %c0_6] : memref<32x128xbf16, #tpu.memory_space<vmem>>, vector<32x128xbf16>
    %cst_7 = arith.constant dense<0.000000e+00> : vector<16x128xf32>
    %7 = tpu.matmul %3, %6, %cst_7 {dimension_numbers = #tpu.dot_dimension_numbers<[1], [0], [0], [1], [0, 0, 1, 1], [], []>} : vector<16x32xbf16>, vector<32x128xbf16>, vector<16x128xf32> -> vector<16x128xf32>
    %8 = arith.addf %5, %7 : vector<16x128xf32>
    %c0_8 = arith.constant 0 : index
    %c0_9 = arith.constant 0 : index
    %9 = vector.load %arg5[%c0_8, %c0_9] : memref<1x128xf32, #tpu.memory_space<vmem>>, vector<1x128xf32>
    %10 = vector.broadcast %9 : vector<1x128xf32> to vector<16x128xf32>
    %11 = arith.addf %8, %10 : vector<16x128xf32>
    %c0_10 = arith.constant 0 : index
    %c0_11 = arith.constant 0 : index
    %12 = vector.load %arg9[%c0_10, %c0_11] : memref<16x128xf32, #tpu.memory_space<vmem>>, vector<16x128xf32>
    tpu.vector_store %arg9[%c0_10, %c0_11], %11 {strides = array<i32>} : memref<16x128xf32, #tpu.memory_space<vmem>>, vector<16x128xf32>,
    %c0_12 = arith.constant 0 : index
    %c0_13 = arith.constant 0 : index
    %13 = vector.load %arg6[%c0_12, %c0_13] : memref<32x128xbf16, #tpu.memory_space<vmem>>, vector<32x128xbf16>
    %cst_14 = arith.constant dense<0.000000e+00> : vector<16x128xf32>
    %14 = tpu.matmul %1, %13, %cst_14 {dimension_numbers = #tpu.dot_dimension_numbers<[1], [0], [0], [1], [0, 0, 1, 1], [], []>} : vector<16x32xbf16>, vector<32x128xbf16>, vector<16x128xf32> -> vector<16x128xf32>
    %c0_15 = arith.constant 0 : index
    %c0_16 = arith.constant 0 : index
    %15 = vector.load %arg7[%c0_15, %c0_16] : memref<32x128xbf16, #tpu.memory_space<vmem>>, vector<32x128xbf16>
    %cst_17 = arith.constant dense<0.000000e+00> : vector<16x128xf32>
    %16 = tpu.matmul %3, %15, %cst_17 {dimension_numbers = #tpu.dot_dimension_numbers<[1], [0], [0], [1], [0, 0, 1, 1], [], []>} : vector<16x32xbf16>, vector<32x128xbf16>, vector<16x128xf32> -> vector<16x128xf32>
    %17 = arith.addf %14, %16 : vector<16x128xf32>
    %c0_18 = arith.constant 0 : index
    %c0_19 = arith.constant 0 : index
    %18 = vector.load %arg8[%c0_18, %c0_19] : memref<1x128xf32, #tpu.memory_space<vmem>>, vector<1x128xf32>
    %19 = vector.broadcast %18 : vector<1x128xf32> to vector<16x128xf32>
    %20 = arith.addf %17, %19 : vector<16x128xf32>
    %c0_20 = arith.constant 0 : index
    %c0_21 = arith.constant 0 : index
    %21 = vector.load %arg10[%c0_20, %c0_21] : memref<16x128xf32, #tpu.memory_space<vmem>>, vector<16x128xf32>
    tpu.vector_store %arg10[%c0_20, %c0_21], %20 {strides = array<i32>} : memref<16x128xf32, #tpu.memory_space<vmem>>, vector<16x128xf32>,
    return
  }
  func.func @transform_0(%arg0: i32) -> (i32, i32) {
    %c0_i32 = arith.constant 0 : i32
    %c0_i32_0 = arith.constant 0 : i32
    return %arg0, %c0_i32 : i32, i32
  }
  func.func @transform_1(%arg0: i32) -> (i32, i32) {
    %c0_i32 = arith.constant 0 : i32
    %c0_i32_0 = arith.constant 0 : i32
    return %arg0, %c0_i32 : i32, i32
  }
  func.func @transform_2(%arg0: i32) -> (i32, i32) {
    %c0_i32 = arith.constant 0 : i32
    %c0_i32_0 = arith.constant 0 : i32
    %c0_i32_1 = arith.constant 0 : i32
    return %c0_i32, %c0_i32_0 : i32, i32
  }
  func.func @transform_3(%arg0: i32) -> (i32, i32) {
    %c0_i32 = arith.constant 0 : i32
    %c0_i32_0 = arith.constant 0 : i32
    %c0_i32_1 = arith.constant 0 : i32
    return %c0_i32, %c0_i32_0 : i32, i32
  }
  func.func @transform_4(%arg0: i32) -> (i32, i32) {
    %c0_i32 = arith.constant 0 : i32
    %c0_i32_0 = arith.constant 0 : i32
    %c0_i32_1 = arith.constant 0 : i32
    return %c0_i32, %c0_i32_0 : i32, i32
  }
  func.func @transform_5(%arg0: i32) -> (i32, i32) {
    %c0_i32 = arith.constant 0 : i32
    %c0_i32_0 = arith.constant 0 : i32
    %c0_i32_1 = arith.constant 0 : i32
    return %c0_i32, %c0_i32_0 : i32, i32
  }
  func.func @transform_6(%arg0: i32) -> (i32, i32) {
    %c0_i32 = arith.constant 0 : i32
    %c0_i32_0 = arith.constant 0 : i32
    %c0_i32_1 = arith.constant 0 : i32
    return %c0_i32, %c0_i32_0 : i32, i32
  }
  func.func @transform_7(%arg0: i32) -> (i32, i32) {
    %c0_i32 = arith.constant 0 : i32
    %c0_i32_0 = arith.constant 0 : i32
    %c0_i32_1 = arith.constant 0 : i32
    return %c0_i32, %c0_i32_0 : i32, i32
  }
  func.func @transform_8(%arg0: i32) -> (i32, i32) {
    %c0_i32 = arith.constant 0 : i32
    %c0_i32_0 = arith.constant 0 : i32
    return %arg0, %c0_i32 : i32, i32
  }
  func.func @transform_9(%arg0: i32) -> (i32, i32) {
    %c0_i32 = arith.constant 0 : i32
    %c0_i32_0 = arith.constant 0 : i32
    return %arg0, %c0_i32 : i32, i32
  }
}

module attributes {stable_mosaic.version = 11 : i64} {
  func.func @_attn_head_kernel(%arg0: i32, %arg1: memref<8x2x32xf32, #tpu.memory_space<vmem>>, %arg2: memref<8x2x32xf32, #tpu.memory_space<vmem>>, %arg3: memref<32x128xbf16, #tpu.memory_space<vmem>>, %arg4: memref<32x128xbf16, #tpu.memory_space<vmem>>, %arg5: memref<1x128xf32, #tpu.memory_space<vmem>>, %arg6: memref<128x4xbf16, #tpu.memory_space<vmem>>, %arg7: memref<1x4xf32, #tpu.memory_space<vmem>>, %arg8: memref<256x32xbf16, #tpu.memory_space<vmem>>, %arg9: memref<1x32xf32, #tpu.memory_space<vmem>>, %arg10: memref<1x32xf32, #tpu.memory_space<vmem>>, %arg11: memref<1x32xf32, #tpu.memory_space<vmem>>, %arg12: memref<32x16xbf16, #tpu.memory_space<vmem>>, %arg13: memref<1x16xf32, #tpu.memory_space<vmem>>, %arg14: memref<1x16xf32, #tpu.memory_space<vmem>>, %arg15: memref<1x16xf32, #tpu.memory_space<vmem>>, %arg16: memref<1x16xf32, #tpu.memory_space<vmem>>, %arg17: memref<1x1xf32, #tpu.memory_space<vmem>>, %arg18: memref<2x1xf32, #tpu.memory_space<vmem>>, %arg19: memref<8x2x4xf32, #tpu.memory_space<vmem>>, %arg20: memref<2x256xf32, #tpu.memory_space<vmem>>) attributes {dimension_semantics = [#tpu.dimension_semantics<parallel>], iteration_bounds = array<i64: 1>, scalar_prefetch = 0 : i64, scratch_operands = 2 : i64, tpu.core_type = #tpu.core_type<tc>, window_params = [{transform_indices = @transform_0, window_bounds = array<i64: 8, 2, 32>}, {transform_indices = @transform_1, window_bounds = array<i64: 8, 2, 32>}, {pipeline_mode = #tpu.pipeline_mode<synchronous>, transform_indices = @transform_2, window_bounds = array<i64: 32, 128>}, {pipeline_mode = #tpu.pipeline_mode<synchronous>, transform_indices = @transform_3, window_bounds = array<i64: 32, 128>}, {pipeline_mode = #tpu.pipeline_mode<synchronous>, transform_indices = @transform_4, window_bounds = array<i64: 1, 128>}, {pipeline_mode = #tpu.pipeline_mode<synchronous>, transform_indices = @transform_5, window_bounds = array<i64: 128, 4>}, {pipeline_mode = #tpu.pipeline_mode<synchronous>, transform_indices = @transform_6, window_bounds = array<i64: 1, 4>}, {pipeline_mode = #tpu.pipeline_mode<synchronous>, transform_indices = @transform_7, window_bounds = array<i64: 256, 32>}, {pipeline_mode = #tpu.pipeline_mode<synchronous>, transform_indices = @transform_8, window_bounds = array<i64: 1, 32>}, {pipeline_mode = #tpu.pipeline_mode<synchronous>, transform_indices = @transform_9, window_bounds = array<i64: 1, 32>}, {pipeline_mode = #tpu.pipeline_mode<synchronous>, transform_indices = @transform_10, window_bounds = array<i64: 1, 32>}, {pipeline_mode = #tpu.pipeline_mode<synchronous>, transform_indices = @transform_11, window_bounds = array<i64: 32, 16>}, {pipeline_mode = #tpu.pipeline_mode<synchronous>, transform_indices = @transform_12, window_bounds = array<i64: 1, 16>}, {pipeline_mode = #tpu.pipeline_mode<synchronous>, transform_indices = @transform_13, window_bounds = array<i64: 1, 16>}, {pipeline_mode = #tpu.pipeline_mode<synchronous>, transform_indices = @transform_14, window_bounds = array<i64: 1, 16>}, {pipeline_mode = #tpu.pipeline_mode<synchronous>, transform_indices = @transform_15, window_bounds = array<i64: 1, 16>}, {pipeline_mode = #tpu.pipeline_mode<synchronous>, transform_indices = @transform_16, window_bounds = array<i64: 1, 1>}, {transform_indices = @transform_17, window_bounds = array<i64: 2, 1>}]} {
    %c0 = arith.constant 0 : index
    %c0_0 = arith.constant 0 : index
    %0 = vector.load %arg3[%c0, %c0_0] : memref<32x128xbf16, #tpu.memory_space<vmem>>, vector<32x128xbf16>
    %c0_1 = arith.constant 0 : index
    %c0_2 = arith.constant 0 : index
    %1 = vector.load %arg4[%c0_1, %c0_2] : memref<32x128xbf16, #tpu.memory_space<vmem>>, vector<32x128xbf16>
    %c0_3 = arith.constant 0 : index
    %c0_4 = arith.constant 0 : index
    %2 = vector.load %arg5[%c0_3, %c0_4] : memref<1x128xf32, #tpu.memory_space<vmem>>, vector<1x128xf32>
    %c0_5 = arith.constant 0 : index
    %c0_6 = arith.constant 0 : index
    %3 = vector.load %arg6[%c0_5, %c0_6] : memref<128x4xbf16, #tpu.memory_space<vmem>>, vector<128x4xbf16>
    %c0_7 = arith.constant 0 : index
    %c0_8 = arith.constant 0 : index
    %4 = vector.load %arg7[%c0_7, %c0_8] : memref<1x4xf32, #tpu.memory_space<vmem>>, vector<1x4xf32>
    %c0_i32 = arith.constant 0 : i32
    %c8_i32 = arith.constant 8 : i32
    %5 = arith.addi %c0_i32, %c8_i32 : i32
    %c1_i32 = arith.constant 1 : i32
    scf.for %arg21 = %c0_i32 to %5 step %c1_i32  : i32 {
      %128 = arith.index_cast %arg21 : i32 to index
      %c0_76 = arith.constant 0 : index
      %c0_77 = arith.constant 0 : index
      %129 = vector.load %arg1[%128, %c0_76, %c0_77] : memref<8x2x32xf32, #tpu.memory_space<vmem>>, vector<1x2x32xf32>
      %130 = vector.shape_cast %129 : vector<1x2x32xf32> to vector<2x32xf32>
      %131 = arith.truncf %130 : vector<2x32xf32> to vector<2x32xbf16>
      %132 = arith.index_cast %arg21 : i32 to index
      %c0_78 = arith.constant 0 : index
      %c0_79 = arith.constant 0 : index
      %133 = vector.load %arg2[%132, %c0_78, %c0_79] : memref<8x2x32xf32, #tpu.memory_space<vmem>>, vector<1x2x32xf32>
      %134 = vector.shape_cast %133 : vector<1x2x32xf32> to vector<2x32xf32>
      %135 = arith.truncf %134 : vector<2x32xf32> to vector<2x32xbf16>
      %cst_80 = arith.constant dense<0.000000e+00> : vector<2x128xf32>
      %136 = tpu.matmul %131, %0, %cst_80 {dimension_numbers = #tpu.dot_dimension_numbers<[1], [0], [0], [1], [0, 0, 1, 1], [], []>} : vector<2x32xbf16>, vector<32x128xbf16>, vector<2x128xf32> -> vector<2x128xf32>
      %cst_81 = arith.constant dense<0.000000e+00> : vector<2x128xf32>
      %137 = tpu.matmul %135, %1, %cst_81 {dimension_numbers = #tpu.dot_dimension_numbers<[1], [0], [0], [1], [0, 0, 1, 1], [], []>} : vector<2x32xbf16>, vector<32x128xbf16>, vector<2x128xf32> -> vector<2x128xf32>
      %138 = arith.addf %136, %137 : vector<2x128xf32>
      %139 = vector.broadcast %2 : vector<1x128xf32> to vector<2x128xf32>
      %140 = arith.addf %138, %139 : vector<2x128xf32>
      %141 = math.tanh %140 : vector<2x128xf32>
      %142 = arith.truncf %141 : vector<2x128xf32> to vector<2x128xbf16>
      %cst_82 = arith.constant dense<0.000000e+00> : vector<2x4xf32>
      %143 = tpu.matmul %142, %3, %cst_82 {dimension_numbers = #tpu.dot_dimension_numbers<[1], [0], [0], [1], [0, 0, 1, 1], [], []>} : vector<2x128xbf16>, vector<128x4xbf16>, vector<2x4xf32> -> vector<2x4xf32>
      %144 = vector.broadcast %4 : vector<1x4xf32> to vector<2x4xf32>
      %145 = arith.addf %143, %144 : vector<2x4xf32>
      %146 = arith.index_cast %arg21 : i32 to index
      %c0_83 = arith.constant 0 : index
      %c0_84 = arith.constant 0 : index
      %147 = vector.load %arg19[%146, %c0_83, %c0_84] : memref<8x2x4xf32, #tpu.memory_space<vmem>>, vector<1x2x4xf32>
      %148 = vector.shape_cast %147 : vector<1x2x4xf32> to vector<2x4xf32>
      %149 = vector.shape_cast %145 : vector<2x4xf32> to vector<1x2x4xf32>
      tpu.vector_store %arg19[%146, %c0_83, %c0_84], %149 {strides = array<i32>} : memref<8x2x4xf32, #tpu.memory_space<vmem>>, vector<1x2x4xf32>,
    }
    %c8_i32_9 = arith.constant 8 : i32
    %c0_10 = arith.constant 0 : index
    %c0_11 = arith.constant 0 : index
    %c0_12 = arith.constant 0 : index
    %6 = vector.load %arg19[%c0_10, %c0_11, %c0_12] : memref<8x2x4xf32, #tpu.memory_space<vmem>>, vector<8x2x4xf32>
    %cst = arith.constant dense<0xFF800000> : vector<2x4xf32>
    %7 = vector.multi_reduction <maximumf>, %6, %cst [0] : vector<8x2x4xf32> to vector<2x4xf32>
    %8 = vector.shape_cast %7 : vector<2x4xf32> to vector<1x2x4xf32>
    %9 = vector.broadcast %8 : vector<1x2x4xf32> to vector<8x2x4xf32>
    %10 = arith.subf %6, %9 : vector<8x2x4xf32>
    %11 = math.exp %10 : vector<8x2x4xf32>
    %cst_13 = arith.constant dense<0.000000e+00> : vector<2x4xf32>
    %12 = vector.multi_reduction <add>, %11, %cst_13 [0] : vector<8x2x4xf32> to vector<2x4xf32>
    %13 = vector.shape_cast %12 : vector<2x4xf32> to vector<1x2x4xf32>
    %14 = vector.broadcast %13 : vector<1x2x4xf32> to vector<8x2x4xf32>
    %15 = arith.divf %11, %14 : vector<8x2x4xf32>
    %c0_14 = arith.constant 0 : index
    %c0_15 = arith.constant 0 : index
    %c0_16 = arith.constant 0 : index
    %16 = vector.load %arg1[%c0_14, %c0_15, %c0_16] : memref<8x2x32xf32, #tpu.memory_space<vmem>>, vector<8x2x32xf32>
    %c0_17 = arith.constant 0 : index
    %c0_18 = arith.constant 0 : index
    %c0_19 = arith.constant 0 : index
    %17 = vector.load %arg2[%c0_17, %c0_18, %c0_19] : memref<8x2x32xf32, #tpu.memory_space<vmem>>, vector<8x2x32xf32>
    %18 = vector.extract_strided_slice %15 {offsets = [0, 0, 0], sizes = [8, 2, 1], strides = [1, 1, 1]} : vector<8x2x4xf32> to vector<8x2x1xf32>
    %19 = vector.broadcast %18 : vector<8x2x1xf32> to vector<8x2x32xf32>
    %20 = arith.mulf %19, %16 : vector<8x2x32xf32>
    %cst_20 = arith.constant dense<0.000000e+00> : vector<2x32xf32>
    %21 = vector.multi_reduction <add>, %20, %cst_20 [0] : vector<8x2x32xf32> to vector<2x32xf32>
    %c0_21 = arith.constant 0 : index
    %c0_22 = arith.constant 0 : index
    %22 = vector.load %arg20[%c0_21, %c0_22] : memref<2x256xf32, #tpu.memory_space<vmem>>, vector<2x32xf32>
    tpu.vector_store %arg20[%c0_21, %c0_22], %21 {strides = array<i32>} : memref<2x256xf32, #tpu.memory_space<vmem>>, vector<2x32xf32>,
    %23 = vector.broadcast %18 : vector<8x2x1xf32> to vector<8x2x32xf32>
    %24 = arith.mulf %23, %17 : vector<8x2x32xf32>
    %cst_23 = arith.constant dense<0.000000e+00> : vector<2x32xf32>
    %25 = vector.multi_reduction <add>, %24, %cst_23 [0] : vector<8x2x32xf32> to vector<2x32xf32>
    %c0_24 = arith.constant 0 : index
    %c32 = arith.constant 32 : index
    %26 = vector.load %arg20[%c0_24, %c32] : memref<2x256xf32, #tpu.memory_space<vmem>>, vector<2x32xf32>
    tpu.vector_store %arg20[%c0_24, %c32], %25 {strides = array<i32>} : memref<2x256xf32, #tpu.memory_space<vmem>>, vector<2x32xf32>,
    %27 = vector.extract_strided_slice %15 {offsets = [0, 0, 1], sizes = [8, 2, 1], strides = [1, 1, 1]} : vector<8x2x4xf32> to vector<8x2x1xf32>
    %28 = vector.broadcast %27 : vector<8x2x1xf32> to vector<8x2x32xf32>
    %29 = arith.mulf %28, %16 : vector<8x2x32xf32>
    %cst_25 = arith.constant dense<0.000000e+00> : vector<2x32xf32>
    %30 = vector.multi_reduction <add>, %29, %cst_25 [0] : vector<8x2x32xf32> to vector<2x32xf32>
    %c0_26 = arith.constant 0 : index
    %c64 = arith.constant 64 : index
    %31 = vector.load %arg20[%c0_26, %c64] : memref<2x256xf32, #tpu.memory_space<vmem>>, vector<2x32xf32>
    tpu.vector_store %arg20[%c0_26, %c64], %30 {strides = array<i32>} : memref<2x256xf32, #tpu.memory_space<vmem>>, vector<2x32xf32>,
    %32 = vector.broadcast %27 : vector<8x2x1xf32> to vector<8x2x32xf32>
    %33 = arith.mulf %32, %17 : vector<8x2x32xf32>
    %cst_27 = arith.constant dense<0.000000e+00> : vector<2x32xf32>
    %34 = vector.multi_reduction <add>, %33, %cst_27 [0] : vector<8x2x32xf32> to vector<2x32xf32>
    %c0_28 = arith.constant 0 : index
    %c96 = arith.constant 96 : index
    %35 = vector.load %arg20[%c0_28, %c96] : memref<2x256xf32, #tpu.memory_space<vmem>>, vector<2x32xf32>
    tpu.vector_store %arg20[%c0_28, %c96], %34 {strides = array<i32>} : memref<2x256xf32, #tpu.memory_space<vmem>>, vector<2x32xf32>,
    %36 = vector.extract_strided_slice %15 {offsets = [0, 0, 2], sizes = [8, 2, 1], strides = [1, 1, 1]} : vector<8x2x4xf32> to vector<8x2x1xf32>
    %37 = vector.broadcast %36 : vector<8x2x1xf32> to vector<8x2x32xf32>
    %38 = arith.mulf %37, %16 : vector<8x2x32xf32>
    %cst_29 = arith.constant dense<0.000000e+00> : vector<2x32xf32>
    %39 = vector.multi_reduction <add>, %38, %cst_29 [0] : vector<8x2x32xf32> to vector<2x32xf32>
    %c0_30 = arith.constant 0 : index
    %c128 = arith.constant 128 : index
    %40 = vector.load %arg20[%c0_30, %c128] : memref<2x256xf32, #tpu.memory_space<vmem>>, vector<2x32xf32>
    tpu.vector_store %arg20[%c0_30, %c128], %39 {strides = array<i32>} : memref<2x256xf32, #tpu.memory_space<vmem>>, vector<2x32xf32>,
    %41 = vector.broadcast %36 : vector<8x2x1xf32> to vector<8x2x32xf32>
    %42 = arith.mulf %41, %17 : vector<8x2x32xf32>
    %cst_31 = arith.constant dense<0.000000e+00> : vector<2x32xf32>
    %43 = vector.multi_reduction <add>, %42, %cst_31 [0] : vector<8x2x32xf32> to vector<2x32xf32>
    %c0_32 = arith.constant 0 : index
    %c160 = arith.constant 160 : index
    %44 = vector.load %arg20[%c0_32, %c160] : memref<2x256xf32, #tpu.memory_space<vmem>>, vector<2x32xf32>
    tpu.vector_store %arg20[%c0_32, %c160], %43 {strides = array<i32>} : memref<2x256xf32, #tpu.memory_space<vmem>>, vector<2x32xf32>,
    %45 = vector.extract_strided_slice %15 {offsets = [0, 0, 3], sizes = [8, 2, 1], strides = [1, 1, 1]} : vector<8x2x4xf32> to vector<8x2x1xf32>
    %46 = vector.broadcast %45 : vector<8x2x1xf32> to vector<8x2x32xf32>
    %47 = arith.mulf %46, %16 : vector<8x2x32xf32>
    %cst_33 = arith.constant dense<0.000000e+00> : vector<2x32xf32>
    %48 = vector.multi_reduction <add>, %47, %cst_33 [0] : vector<8x2x32xf32> to vector<2x32xf32>
    %c0_34 = arith.constant 0 : index
    %c192 = arith.constant 192 : index
    %49 = vector.load %arg20[%c0_34, %c192] : memref<2x256xf32, #tpu.memory_space<vmem>>, vector<2x32xf32>
    tpu.vector_store %arg20[%c0_34, %c192], %48 {strides = array<i32>} : memref<2x256xf32, #tpu.memory_space<vmem>>, vector<2x32xf32>,
    %50 = vector.broadcast %45 : vector<8x2x1xf32> to vector<8x2x32xf32>
    %51 = arith.mulf %50, %17 : vector<8x2x32xf32>
    %cst_35 = arith.constant dense<0.000000e+00> : vector<2x32xf32>
    %52 = vector.multi_reduction <add>, %51, %cst_35 [0] : vector<8x2x32xf32> to vector<2x32xf32>
    %c0_36 = arith.constant 0 : index
    %c224 = arith.constant 224 : index
    %53 = vector.load %arg20[%c0_36, %c224] : memref<2x256xf32, #tpu.memory_space<vmem>>, vector<2x32xf32>
    tpu.vector_store %arg20[%c0_36, %c224], %52 {strides = array<i32>} : memref<2x256xf32, #tpu.memory_space<vmem>>, vector<2x32xf32>,
    %c0_37 = arith.constant 0 : index
    %c0_38 = arith.constant 0 : index
    %54 = vector.load %arg20[%c0_37, %c0_38] : memref<2x256xf32, #tpu.memory_space<vmem>>, vector<2x256xf32>
    %55 = arith.truncf %54 : vector<2x256xf32> to vector<2x256xbf16>
    %c0_39 = arith.constant 0 : index
    %c0_40 = arith.constant 0 : index
    %56 = vector.load %arg8[%c0_39, %c0_40] : memref<256x32xbf16, #tpu.memory_space<vmem>>, vector<256x32xbf16>
    %cst_41 = arith.constant dense<0.000000e+00> : vector<2x32xf32>
    %57 = tpu.matmul %55, %56, %cst_41 {dimension_numbers = #tpu.dot_dimension_numbers<[1], [0], [0], [1], [0, 0, 1, 1], [], []>} : vector<2x256xbf16>, vector<256x32xbf16>, vector<2x32xf32> -> vector<2x32xf32>
    %c0_42 = arith.constant 0 : index
    %c0_43 = arith.constant 0 : index
    %58 = vector.load %arg9[%c0_42, %c0_43] : memref<1x32xf32, #tpu.memory_space<vmem>>, vector<1x32xf32>
    %59 = vector.broadcast %58 : vector<1x32xf32> to vector<2x32xf32>
    %60 = arith.addf %57, %59 : vector<2x32xf32>
    %c0_44 = arith.constant 0 : index
    %c0_45 = arith.constant 0 : index
    %61 = vector.load %arg10[%c0_44, %c0_45] : memref<1x32xf32, #tpu.memory_space<vmem>>, vector<1x32xf32>
    %c0_46 = arith.constant 0 : index
    %c0_47 = arith.constant 0 : index
    %62 = vector.load %arg11[%c0_46, %c0_47] : memref<1x32xf32, #tpu.memory_space<vmem>>, vector<1x32xf32>
    %cst_48 = arith.constant dense<0.000000e+00> : vector<2xf32>
    %63 = vector.multi_reduction <add>, %60, %cst_48 [1] : vector<2x32xf32> to vector<2xf32>
    %64 = vector.shape_cast %63 : vector<2xf32> to vector<2x1xf32>
    %cst_49 = arith.constant 3.200000e+01 : f32
    %65 = vector.broadcast %cst_49 : f32 to vector<2x1xf32>
    %66 = arith.divf %64, %65 : vector<2x1xf32>
    %67 = vector.broadcast %66 : vector<2x1xf32> to vector<2x32xf32>
    %68 = arith.subf %60, %67 : vector<2x32xf32>
    %69 = arith.mulf %68, %68 : vector<2x32xf32>
    %cst_50 = arith.constant dense<0.000000e+00> : vector<2xf32>
    %70 = vector.multi_reduction <add>, %69, %cst_50 [1] : vector<2x32xf32> to vector<2xf32>
    %71 = vector.shape_cast %70 : vector<2xf32> to vector<2x1xf32>
    %cst_51 = arith.constant 3.200000e+01 : f32
    %72 = vector.broadcast %cst_51 : f32 to vector<2x1xf32>
    %73 = arith.divf %71, %72 : vector<2x1xf32>
    %74 = vector.broadcast %66 : vector<2x1xf32> to vector<2x32xf32>
    %75 = arith.subf %60, %74 : vector<2x32xf32>
    %cst_52 = arith.constant 9.99999974E-6 : f32
    %76 = vector.broadcast %cst_52 : f32 to vector<2x1xf32>
    %77 = arith.addf %73, %76 : vector<2x1xf32>
    %78 = math.rsqrt %77 : vector<2x1xf32>
    %79 = vector.broadcast %78 : vector<2x1xf32> to vector<2x32xf32>
    %80 = arith.mulf %75, %79 : vector<2x32xf32>
    %81 = vector.broadcast %61 : vector<1x32xf32> to vector<2x32xf32>
    %82 = arith.mulf %80, %81 : vector<2x32xf32>
    %83 = vector.broadcast %62 : vector<1x32xf32> to vector<2x32xf32>
    %84 = arith.addf %82, %83 : vector<2x32xf32>
    %cst_53 = arith.constant 0.000000e+00 : f32
    %85 = vector.broadcast %cst_53 : f32 to vector<2x32xf32>
    %86 = arith.maximumf %84, %85 : vector<2x32xf32>
    %87 = arith.truncf %86 : vector<2x32xf32> to vector<2x32xbf16>
    %c0_54 = arith.constant 0 : index
    %c0_55 = arith.constant 0 : index
    %88 = vector.load %arg12[%c0_54, %c0_55] : memref<32x16xbf16, #tpu.memory_space<vmem>>, vector<32x16xbf16>
    %cst_56 = arith.constant dense<0.000000e+00> : vector<2x16xf32>
    %89 = tpu.matmul %87, %88, %cst_56 {dimension_numbers = #tpu.dot_dimension_numbers<[1], [0], [0], [1], [0, 0, 1, 1], [], []>} : vector<2x32xbf16>, vector<32x16xbf16>, vector<2x16xf32> -> vector<2x16xf32>
    %c0_57 = arith.constant 0 : index
    %c0_58 = arith.constant 0 : index
    %90 = vector.load %arg13[%c0_57, %c0_58] : memref<1x16xf32, #tpu.memory_space<vmem>>, vector<1x16xf32>
    %91 = vector.broadcast %90 : vector<1x16xf32> to vector<2x16xf32>
    %92 = arith.addf %89, %91 : vector<2x16xf32>
    %c0_59 = arith.constant 0 : index
    %c0_60 = arith.constant 0 : index
    %93 = vector.load %arg14[%c0_59, %c0_60] : memref<1x16xf32, #tpu.memory_space<vmem>>, vector<1x16xf32>
    %c0_61 = arith.constant 0 : index
    %c0_62 = arith.constant 0 : index
    %94 = vector.load %arg15[%c0_61, %c0_62] : memref<1x16xf32, #tpu.memory_space<vmem>>, vector<1x16xf32>
    %cst_63 = arith.constant dense<0.000000e+00> : vector<2xf32>
    %95 = vector.multi_reduction <add>, %92, %cst_63 [1] : vector<2x16xf32> to vector<2xf32>
    %96 = vector.shape_cast %95 : vector<2xf32> to vector<2x1xf32>
    %cst_64 = arith.constant 1.600000e+01 : f32
    %97 = vector.broadcast %cst_64 : f32 to vector<2x1xf32>
    %98 = arith.divf %96, %97 : vector<2x1xf32>
    %99 = vector.broadcast %98 : vector<2x1xf32> to vector<2x16xf32>
    %100 = arith.subf %92, %99 : vector<2x16xf32>
    %101 = arith.mulf %100, %100 : vector<2x16xf32>
    %cst_65 = arith.constant dense<0.000000e+00> : vector<2xf32>
    %102 = vector.multi_reduction <add>, %101, %cst_65 [1] : vector<2x16xf32> to vector<2xf32>
    %103 = vector.shape_cast %102 : vector<2xf32> to vector<2x1xf32>
    %cst_66 = arith.constant 1.600000e+01 : f32
    %104 = vector.broadcast %cst_66 : f32 to vector<2x1xf32>
    %105 = arith.divf %103, %104 : vector<2x1xf32>
    %106 = vector.broadcast %98 : vector<2x1xf32> to vector<2x16xf32>
    %107 = arith.subf %92, %106 : vector<2x16xf32>
    %cst_67 = arith.constant 9.99999974E-6 : f32
    %108 = vector.broadcast %cst_67 : f32 to vector<2x1xf32>
    %109 = arith.addf %105, %108 : vector<2x1xf32>
    %110 = math.rsqrt %109 : vector<2x1xf32>
    %111 = vector.broadcast %110 : vector<2x1xf32> to vector<2x16xf32>
    %112 = arith.mulf %107, %111 : vector<2x16xf32>
    %113 = vector.broadcast %93 : vector<1x16xf32> to vector<2x16xf32>
    %114 = arith.mulf %112, %113 : vector<2x16xf32>
    %115 = vector.broadcast %94 : vector<1x16xf32> to vector<2x16xf32>
    %116 = arith.addf %114, %115 : vector<2x16xf32>
    %cst_68 = arith.constant 0.000000e+00 : f32
    %117 = vector.broadcast %cst_68 : f32 to vector<2x16xf32>
    %118 = arith.maximumf %116, %117 : vector<2x16xf32>
    %c0_69 = arith.constant 0 : index
    %c0_70 = arith.constant 0 : index
    %119 = vector.load %arg16[%c0_69, %c0_70] : memref<1x16xf32, #tpu.memory_space<vmem>>, vector<1x16xf32>
    %120 = vector.broadcast %119 : vector<1x16xf32> to vector<2x16xf32>
    %121 = arith.mulf %118, %120 : vector<2x16xf32>
    %cst_71 = arith.constant dense<0.000000e+00> : vector<2xf32>
    %122 = vector.multi_reduction <add>, %121, %cst_71 [1] : vector<2x16xf32> to vector<2xf32>
    %123 = vector.shape_cast %122 : vector<2xf32> to vector<2x1xf32>
    %c0_72 = arith.constant 0 : index
    %c0_73 = arith.constant 0 : index
    %124 = vector.load %arg17[%c0_72, %c0_73] : memref<1x1xf32, #tpu.memory_space<vmem>>, vector<1x1xf32>
    %125 = vector.broadcast %124 : vector<1x1xf32> to vector<2x1xf32>
    %126 = arith.addf %123, %125 : vector<2x1xf32>
    %c0_74 = arith.constant 0 : index
    %c0_75 = arith.constant 0 : index
    %127 = vector.load %arg18[%c0_74, %c0_75] : memref<2x1xf32, #tpu.memory_space<vmem>>, vector<2x1xf32>
    tpu.vector_store %arg18[%c0_74, %c0_75], %126 {strides = array<i32>} : memref<2x1xf32, #tpu.memory_space<vmem>>, vector<2x1xf32>,
    return
  }
  func.func @transform_0(%arg0: i32) -> (i32, i32, i32) {
    %c0_i32 = arith.constant 0 : i32
    %c0_i32_0 = arith.constant 0 : i32
    %c0_i32_1 = arith.constant 0 : i32
    return %c0_i32, %arg0, %c0_i32_0 : i32, i32, i32
  }
  func.func @transform_1(%arg0: i32) -> (i32, i32, i32) {
    %c0_i32 = arith.constant 0 : i32
    %c0_i32_0 = arith.constant 0 : i32
    %c0_i32_1 = arith.constant 0 : i32
    return %c0_i32, %arg0, %c0_i32_0 : i32, i32, i32
  }
  func.func @transform_2(%arg0: i32) -> (i32, i32) {
    %c0_i32 = arith.constant 0 : i32
    %c0_i32_0 = arith.constant 0 : i32
    %c0_i32_1 = arith.constant 0 : i32
    return %c0_i32, %c0_i32_0 : i32, i32
  }
  func.func @transform_3(%arg0: i32) -> (i32, i32) {
    %c0_i32 = arith.constant 0 : i32
    %c0_i32_0 = arith.constant 0 : i32
    %c0_i32_1 = arith.constant 0 : i32
    return %c0_i32, %c0_i32_0 : i32, i32
  }
  func.func @transform_4(%arg0: i32) -> (i32, i32) {
    %c0_i32 = arith.constant 0 : i32
    %c0_i32_0 = arith.constant 0 : i32
    %c0_i32_1 = arith.constant 0 : i32
    return %c0_i32, %c0_i32_0 : i32, i32
  }
  func.func @transform_5(%arg0: i32) -> (i32, i32) {
    %c0_i32 = arith.constant 0 : i32
    %c0_i32_0 = arith.constant 0 : i32
    %c0_i32_1 = arith.constant 0 : i32
    return %c0_i32, %c0_i32_0 : i32, i32
  }
  func.func @transform_6(%arg0: i32) -> (i32, i32) {
    %c0_i32 = arith.constant 0 : i32
    %c0_i32_0 = arith.constant 0 : i32
    %c0_i32_1 = arith.constant 0 : i32
    return %c0_i32, %c0_i32_0 : i32, i32
  }
  func.func @transform_7(%arg0: i32) -> (i32, i32) {
    %c0_i32 = arith.constant 0 : i32
    %c0_i32_0 = arith.constant 0 : i32
    %c0_i32_1 = arith.constant 0 : i32
    return %c0_i32, %c0_i32_0 : i32, i32
  }
  func.func @transform_8(%arg0: i32) -> (i32, i32) {
    %c0_i32 = arith.constant 0 : i32
    %c0_i32_0 = arith.constant 0 : i32
    %c0_i32_1 = arith.constant 0 : i32
    return %c0_i32, %c0_i32_0 : i32, i32
  }
  func.func @transform_9(%arg0: i32) -> (i32, i32) {
    %c0_i32 = arith.constant 0 : i32
    %c0_i32_0 = arith.constant 0 : i32
    %c0_i32_1 = arith.constant 0 : i32
    return %c0_i32, %c0_i32_0 : i32, i32
  }
  func.func @transform_10(%arg0: i32) -> (i32, i32) {
    %c0_i32 = arith.constant 0 : i32
    %c0_i32_0 = arith.constant 0 : i32
    %c0_i32_1 = arith.constant 0 : i32
    return %c0_i32, %c0_i32_0 : i32, i32
  }
  func.func @transform_11(%arg0: i32) -> (i32, i32) {
    %c0_i32 = arith.constant 0 : i32
    %c0_i32_0 = arith.constant 0 : i32
    %c0_i32_1 = arith.constant 0 : i32
    return %c0_i32, %c0_i32_0 : i32, i32
  }
  func.func @transform_12(%arg0: i32) -> (i32, i32) {
    %c0_i32 = arith.constant 0 : i32
    %c0_i32_0 = arith.constant 0 : i32
    %c0_i32_1 = arith.constant 0 : i32
    return %c0_i32, %c0_i32_0 : i32, i32
  }
  func.func @transform_13(%arg0: i32) -> (i32, i32) {
    %c0_i32 = arith.constant 0 : i32
    %c0_i32_0 = arith.constant 0 : i32
    %c0_i32_1 = arith.constant 0 : i32
    return %c0_i32, %c0_i32_0 : i32, i32
  }
  func.func @transform_14(%arg0: i32) -> (i32, i32) {
    %c0_i32 = arith.constant 0 : i32
    %c0_i32_0 = arith.constant 0 : i32
    %c0_i32_1 = arith.constant 0 : i32
    return %c0_i32, %c0_i32_0 : i32, i32
  }
  func.func @transform_15(%arg0: i32) -> (i32, i32) {
    %c0_i32 = arith.constant 0 : i32
    %c0_i32_0 = arith.constant 0 : i32
    %c0_i32_1 = arith.constant 0 : i32
    return %c0_i32, %c0_i32_0 : i32, i32
  }
  func.func @transform_16(%arg0: i32) -> (i32, i32) {
    %c0_i32 = arith.constant 0 : i32
    %c0_i32_0 = arith.constant 0 : i32
    %c0_i32_1 = arith.constant 0 : i32
    return %c0_i32, %c0_i32_0 : i32, i32
  }
  func.func @transform_17(%arg0: i32) -> (i32, i32) {
    %c0_i32 = arith.constant 0 : i32
    %c0_i32_0 = arith.constant 0 : i32
    return %arg0, %c0_i32 : i32, i32
  }
}

</mosaic_0001>

<bundles_post_ra>
// kernel: lstm_ensemble_forward.6
= control target key start
LH: loop header
LB: loop body
LE: loop exit
PB: predicated region body
PF: predicated region fallthrough
CT: control target
= control target key end

     0   :  { %vm57_vm0 = vcmask 254976   ;;  %v452_v0 = vmov 0.0   ;;  %s533_s5 = smov 0   ;;  %s597_s0 = inlined_call_operand.vmem [shape: f32[8,2,128], index: 0, kind: input, shape index: {}]   ;;  %s598_s1 = inlined_call_operand.vmem [shape: f32[8,2,128], index: 1, kind: input, shape index: {}]   ;;  %s599_s2 = inlined_call_operand.vmem [shape: bf16[2,32,128], index: 2, kind: input, shape index: {}]   ;;  %s600_s3 = inlined_call_operand.vmem [shape: f32[8,2,32], index: 3, kind: output, shape index: {0}]   ;;  %s601_s4 = inlined_call_operand.vmem [shape: f32[8,2,32], index: 4, kind: output, shape index: {1}]  }
   0x1   :  { %58 = vst.msk [vmem:[#allocation2] sm:$0x3] %vm57_vm0, %v452_v0  ;;  %v485_v1 = vld [vmem:[%s599_s2] sm:$0xf]  ;;  %v490_v2 = vld [vmem:[%s599_s2] sm:$0xf0] }
   0x2   :  { %59 = vst.msk [vmem:[#allocation3] sm:$0x3] %vm57_vm0, %v452_v0  ;;  %v496_v3 = vld [vmem:[%s599_s2 + $0x8] sm:$0xf]  ;;  %v501_v4 = vld [vmem:[%s599_s2 + $0x8] sm:$0xf0] }
   0x3   :  { %60 = vst.msk [vmem:[#allocation4] sm:$0x3] %vm57_vm0, %v452_v0  ;;  %v507_v5 = vld [vmem:[%s599_s2 + $0x10] sm:$0xf]  ;;  %v512_v6 = vld [vmem:[%s599_s2 + $0x10] sm:$0xf0] }
   0x4   :  { %61 = vst.msk [vmem:[#allocation5] sm:$0x3] %vm57_vm0, %v452_v0  ;;  %v518_v7 = vld [vmem:[%s599_s2 + $0x18] sm:$0xf]  ;;  %v523_v8 = vld [vmem:[%s599_s2 + $0x18] sm:$0xf0] }
   0x8   :  { %v71_v9 = vld [vmem:[#allocation2] sm:$0x3]  }
   0x9   :  { %v72_v10 = vld [vmem:[#allocation3] sm:$0x3]  }
   0xa   :  { %v73_v11 = vld [vmem:[#allocation4] sm:$0x3]  }
   0xb   :  { %v74_v12 = vld [vmem:[#allocation5] sm:$0x3]  }
   0xc LB: > { %v334_v13 = vor.u32 %v501_v4, %v496_v3  ;;  %v344_v14 = vor.u32 %v523_v8, %v518_v7  ;;  %v330_v15 = vor.u32 %v490_v2, %v485_v1  ;;  %v340_v16 = vor.u32 %v512_v6, %v507_v5  ;;  %s453_s2 = smov 32   ;;  %s326_s6 = sshll.u32 %s450_s5, 1  ;;  %s450_s5 = sphi %s533_s5, %s80_s5   ;;  %v446_v9 = vphi %v71_v9, %v605_v9   ;;  %v442_v10 = vphi %v72_v10, %v604_v10   ;;  %v438_v11 = vphi %v73_v11, %v603_v11   ;;  %v434_v12 = vphi %v74_v12, %v602_v12  }
   0xd   : > { %174 = vrot.lane.b32.xlu1 %v442_v10, %s453_s2  ;;  %v89_v17 = vpack.c.bf16 %v446_v9, %v446_v9  ;;  %v123_v18 = vpack.c.bf16 %v438_v11, %v438_v11  ;;  %vm102_vm1 = vcmask 261120   ;;  %s87_s9 = scalar_lea.vmem %s597_s0, %s326_s6  ;;  %s85_s10 = ssub.s32 7, %s450_s5 }
   0xe   : > { %112 = vmatpush.bf16.msra.mxu0 %v334_v13  ;;  %145 = vmatpush.bf16.msra.mxu1 %v344_v14  ;;  %v88_v19 = vld [vmem:[%s87_s9] sm:$0x3]  ;;  %s559_s11 = sshll.u32 %s85_s10, 1  ;;  %s454_s15 = smov 96  }
   0xf   : > { %s121_s14 = scalar_lea.vmem %s598_s1, %s559_s11  ;;  %s455_s16 = smov 64  }
  0x10   : > { %v122_v23 = vld [vmem:[%s121_s14] sm:$0x3]  ;;  %s239_s19 = scalar_lea.vmem %s600_s3, %s326_s6  ;;  %s246_s22 = scalar_lea.vmem %s601_s4, %s559_s11 }
  0x11   : > { %s80_s5 = sadd.s32 1, %s450_s5  }
  0x12   : > { %113 = vmatpush.bf16.msra.mxu0 %v330_v15  ;;  %146 = vmatpush.bf16.msra.mxu1 %v340_v16  ;;  %p77_p0 = scmp.ge.s32.totalorder %s80_s5, 8  }
  0x15   : > { %335 = vmatmul.msk.bf16.vlgmr.msra.gmra.mxu0 %vm102_vm1, %v89_v17  ;;  %345 = vmatmul.msk.bf16.vlgmr.msra.gmra.mxu1 %vm102_vm1, %v123_v18 }
  0x16   : > { %215 = vrot.lane.b32.xlu1 %v434_v12, %s453_s2 }
  0x7f   : > { %v175_v59 = vpop.permute.xlu1 %174 }
  0x88   : > { %v216_v63 = vpop.permute.xlu1 %215 }
  0x92   : > { %v115_v20 = vpop.f32.mrf.mxu0  ;;  %v148_v21 = vpop.f32.mrf.mxu1 }
  0x93   : > { %v119_v22 = vadd.f32 %v115_v20, %v88_v19  ;;  %v152_v24 = vadd.f32 %v148_v21, %v122_v23 }
  0x95   : > { %396 = vtanh.f32 %v119_v22  ;;  %v346_v29 = vmul.f32 -1.442695, %v119_v22  ;;  %v347_v30 = vmul.f32 -1.442695, %v152_v24 }
  0x96   : > { %398 = vtanh.f32 %v152_v24 }
  0x97   : > { %400 = vpow2.f32 %v346_v29 }
  0x98   : > { %402 = vpow2.f32 %v347_v30 }
  0x9a   : > { %v117_v25 = vpop.f32.mrf.mxu0  ;;  %v150_v26 = vpop.f32.mrf.mxu1 }
  0x9b   : > { %v397_v27 = vpop.eup %396 }
  0x9c   : > { %179 = vrot.lane.b32.xlu0 %v397_v27, %s453_s2  ;;  %v399_v28 = vpop.eup %398 }
  0x9d   : > { %v401_v31 = vpop.eup %400 }
  0x9e   : > { %v156_v32 = vadd.f32 1.0, %v401_v31  ;;  %v403_v33 = vpop.eup %402 }
  0x9f   : > { %v197_v34 = vadd.f32 1.0, %v403_v33 }
  0xa0   : > { %404 = vrcp.f32 %v156_v32  ;;  %v168_v43 = vand.u32 2147483648, %v156_v32  ;;  %vm162_vm3 = vweird.f32 %v156_v32  ;;  %v166_v44 = vand.u32 2147483647, %v156_v32 }
  0xa1   : > { %406 = vrcp.f32 %v197_v34  ;;  %vm203_vm6 = vweird.f32 %v197_v34  ;;  %v209_v52 = vand.u32 2147483648, %v197_v34  ;;  %v207_v53 = vand.u32 2147483647, %v197_v34 }
  0xa2   : > { %v169_v47 = vor.u32 1.1754944e-38, %v168_v43  ;;  %vm167_vm5 = vcmp.eq.f32.partialorder %v166_v44, 8.507059e+37 }
  0xa3   : > { %v210_v55 = vor.u32 1.1754944e-38, %v209_v52  ;;  %vm208_vm9 = vcmp.eq.f32.partialorder %v207_v53, 8.507059e+37 }
  0xa4   : > { %220 = vrot.lane.b32.xlu0 %v399_v28, %s453_s2 }
  0xa6   : > { %v405_v35 = vpop.eup %404 }
  0xa7   : > { %v158_v36 = vmul.f32 %v405_v35, %v156_v32  ;;  %v407_v38 = vpop.eup %406  ;;  %vm163_vm2 = vweird.f32 %v405_v35 }
  0xa8   : > { %v199_v40 = vmul.f32 %v407_v38, %v197_v34  ;;  %vm164_vm4 = vmor %vm162_vm3, %vm163_vm2  ;;  %vm204_vm7 = vweird.f32 %v407_v38 }
  0xa9   : > { %v159_v37 = vsub.f32 1.0, %v158_v36  ;;  %vm205_vm8 = vmor %vm203_vm6, %vm204_vm7 }
  0xaa   : > { %v200_v42 = vsub.f32 1.0, %v199_v40 }
  0xab   : > { %v160_v39 = vmul.f32 %v405_v35, %v159_v37 }
  0xac   : > { %v201_v46 = vmul.f32 %v407_v38, %v200_v42 }
  0xad   : > { %v161_v41 = vadd.f32 %v405_v35, %v160_v39 }
  0xae   : > { %v202_v50 = vadd.f32 %v407_v38, %v201_v46 }
  0xaf   : > { %v165_v45 = vsel %vm164_vm4, %v405_v35, %v161_v41 }
  0xb0   : > { %v170_v48 = vsel %vm167_vm5, %v169_v47, %v165_v45  ;;  %v206_v54 = vsel %vm205_vm8, %v407_v38, %v202_v50 }
  0xb1   : > { %v211_v56 = vsel %vm208_vm9, %v210_v55, %v206_v54  ;;  %v177_v60 = vmul.f32 %v175_v59, %v170_v48 }
  0xb2   : > { %v218_v0 = vmul.f32 %v216_v63, %v211_v56 }
 0x10e   : > { %v180_v49 = vpop.permute.xlu0 %179 }
 0x10f   : > { %v182_v51 = vmul.f32 %v180_v49, %v170_v48 }
 0x111   : > { %184 = vrot.lane.b32.xlu2 %v182_v51, %s453_s2 }
 0x116   : > { %v221_v57 = vpop.permute.xlu0 %220 }
 0x117   : > { %v223_v58 = vmul.f32 %v221_v57, %v211_v56 }
 0x119   : > { %225 = vrot.lane.b32.xlu2 %v223_v58, %s453_s2 }
 0x16b   : > { %v185_v61 = vpop.permute.xlu2 %184 }
 0x16c   : > { %v187_v62 = vadd.f32 %v185_v61, %v177_v60 }
 0x16e   : > { %408 = vtanh.f32 %v187_v62 }
 0x173   : > { %v226_v9 = vpop.permute.xlu2 %225 }
 0x174   : > { %v409_v10 = vpop.eup %408  ;;  %v228_v11 = vadd.f32 %v226_v9, %v218_v0 }
 0x175   : > { %190 = vrot.lane.b32.xlu0 %v409_v10, %s453_s2 }
 0x176   : > { %410 = vtanh.f32 %v228_v11 }
 0x17c   : > { %v411_v12 = vpop.eup %410 }
 0x17d   : > { %231 = vrot.lane.b32.xlu1 %v411_v12, %s453_s2 }
 0x185   : > { %249 = vrot.lane.b32.xlu1 %v187_v62, %s454_s15 }
 0x1e7   : > { %v191_v13 = vpop.permute.xlu0 %190 }
 0x1e8   : > { %v193_v14 = vmul.f32 %v191_v13, %v170_v48 }
 0x1ea   : > { %236 = vrot.lane.b32.xlu2 %v193_v14, %s455_s16 }
 0x1ef   : > { %v232_v15 = vpop.permute.xlu1 %231 }
 0x1f0   : > { %v234_v16 = vmul.f32 %v232_v15, %v211_v56 }
 0x1f2   : > { %253 = vrot.lane.b32.xlu2 %v228_v11, %s454_s15  ;;  %243 = vrot.lane.b32.xlu0 %v234_v16, %s455_s16 }
 0x1f7   : > { %v250_v17 = vpop.permute.xlu1 %249  }
 0x1f8   : > { %v604_v10 = vmov %v250_v17  ;;  %258 = vst.msk [vmem:[#allocation3] sm:$0x3] (%p77_p0), %vm57_vm0, %v250_v17 }
 0x244   : > { %v237_v18 = vpop.permute.xlu2 %236  }
 0x245   : > { %241 = vst.msk [vmem:[%s239_s19] sm:$0x3] %vm57_vm0, %v237_v18  ;;  %v605_v9 = vmov %v237_v18 }
 0x246   :  { %257 = vst.msk [vmem:[#allocation2] sm:$0x3] (%p77_p0), %vm57_vm0, %v237_v18 }
 0x24c   : > { %v254_v19 = vpop.permute.xlu2 %253  }
 0x24d   : > { %v602_v12 = vmov %v254_v19  ;;  %260 = vst.msk [vmem:[#allocation5] sm:$0x3] (%p77_p0), %vm57_vm0, %v254_v19 }
 0x261   :  { %79 = sbr.rel (!%p77_p0) target bundleno = 12 (0xc), region = 63 }
 0x264   : > { %v244_v20 = vpop.permute.xlu0 %243  }
 0x265   : > { %247 = vst.msk [vmem:[%s246_s22] sm:$0x3] %vm57_vm0, %v244_v20  ;;  %v603_v11 = vmov %v244_v20 }
 0x266   :  { %259 = vst.msk [vmem:[#allocation4] sm:$0x3] %vm57_vm0, %v244_v20 }

// kernel: lstm_ensemble_forward.5
= control target key start
LH: loop header
LB: loop body
LE: loop exit
PB: predicated region body
PF: predicated region fallthrough
CT: control target
= control target key end

     0   :  { %vm62_vm0 = vcmask 130048   ;;  %vm82_vm1 = vcmask 261120   ;;  %v384_v11 = vmov 32.0   ;;  %s544_s1 = inlined_call_operand.vmem [shape: bf16[16,32], index: 1, kind: input, shape index: {}]   ;;  %s545_s0 = inlined_call_operand.vmem [shape: f32[16,16], index: 0, kind: input, shape index: {}]   ;;  %s546_s2 = inlined_call_operand.vmem [shape: f32[1,32], index: 2, kind: input, shape index: {}]   ;;  %s547_s3 = inlined_call_operand.vmem [shape: f32[1,32], index: 3, kind: input, shape index: {}]   ;;  %s548_s4 = inlined_call_operand.vmem [shape: f32[1,32], index: 4, kind: input, shape index: {}]   ;;  %s549_s6 = inlined_call_operand.vmem [shape: f32[1,32], index: 6, kind: input, shape index: {}]   ;;  %s550_s5 = inlined_call_operand.vmem [shape: bf16[32,32], index: 5, kind: input, shape index: {}]   ;;  %s551_s7 = inlined_call_operand.vmem [shape: f32[1,32], index: 7, kind: input, shape index: {}]   ;;  %s552_s8 = inlined_call_operand.vmem [shape: f32[1,32], index: 8, kind: input, shape index: {}]   ;;  %s553_s10 = inlined_call_operand.vmem [shape: f32[1,128], index: 10, kind: input, shape index: {}]   ;;  %s554_s9 = inlined_call_operand.vmem [shape: bf16[32,128], index: 9, kind: input, shape index: {}]   ;;  %s555_s11 = inlined_call_operand.vmem [shape: bf16[32,128], index: 11, kind: input, shape index: {}]   ;;  %s556_s12 = inlined_call_operand.vmem [shape: f32[1,128], index: 12, kind: input, shape index: {}]   ;;  %s557_s13 = inlined_call_operand.vmem [shape: f32[16,128], index: 13, kind: output, shape index: {0}]   ;;  %s558_s14 = inlined_call_operand.vmem [shape: f32[16,128], index: 14, kind: output, shape index: {1}]  }
   0x1   :  { %v358_v0 = vld [vmem:[%s544_s1] sm:$0xff]  ;;  %v48_v2 = vld [vmem:[%s545_s0 + $0x8] sm:$0xff]  ;;  %374 = vrcp.f32 %v384_v11 }
   0x2   :  { %v47_v1 = vld [vmem:[%s545_s0] sm:$0xff]  ;;  %73 = vmatpush.bf16.msra.mxu0 %v358_v0  ;;  %v360_v28 = vld [vmem:[%s550_s5 + $0x8] sm:$0xff] }
   0x3   :  { %v49_v3 = vpack.c.bf16 %v48_v2, %v47_v1  ;;  %v366_v4 = vld [vmem:[%s546_s2] ss:$0 sm:$0xff]  ;;  %176 = vmatpush.bf16.msra.mxu1 %v360_v28 }
   0x4   :  { %v359_v31 = vld [vmem:[%s550_s5] sm:$0xff] }
   0x5   :  { %330 = vmatmul.msk.bf16.vlgmr.msra.gmra.mxu0 %vm62_vm0, %v49_v3  ;;  %v367_v48 = vld [vmem:[%s547_s3] ss:$0 sm:$0xff] }
   0x6   :  { %v368_v52 = vld [vmem:[%s548_s4] ss:$0 sm:$0xff] }
   0x7   :  { %v375_v12 = vpop.eup %374  ;;  %177 = vmatpush.bf16.msra.mxu1 %v359_v31  ;;  %v369_v61 = vld [vmem:[%s549_s6] ss:$0 sm:$0xff] }
   0x8   :  { %v90_v13 = vmul.f32 32.0, %v375_v12  ;;  %vm94_vm2 = vweird.f32 %v375_v12 }
   0xa   :  { %v91_v14 = vsub.f32 1.0, %v90_v13 }
   0xc   :  { %v92_v15 = vmul.f32 %v375_v12, %v91_v14  ;;  %v362_v14 = vld [vmem:[%s554_s9 + $0x8] sm:$0xff] }
   0xd   :  { %272 = vmatpush.bf16.msra.mxu2 %v362_v14 }
   0xe   :  { %v93_v16 = vadd.f32 %v375_v12, %v92_v15  ;;  %v364_v15 = vld [vmem:[%s555_s11 + $0x8] sm:$0xff] }
   0xf   :  { %308 = vmatpush.bf16.msra.mxu3 %v364_v15 }
  0x10   :  { %v474_v17 = vsel %vm94_vm2, %v375_v12, %v93_v16 }
  0x82   :  { %v75_v5 = vpop.f32.mrf.mxu0 }
  0x83   :  { %v76_v6 = vadd.f32 %v366_v4, %v75_v5 }
  0x85   :  { %v83_v7 = vsel %vm82_vm1, %v76_v6, 0.0 }
  0x86   :  { %84 = vadd.xlane.f32.xlu0 %v83_v7 }
  0x8a   :  { %v77_v8 = vpop.f32.mrf.mxu0 }
  0x8b   :  { %v78_v9 = vadd.f32 %v366_v4, %v77_v8 }
  0x8d   :  { %v86_v10 = vsel %vm82_vm1, %v78_v9, 0.0 }
  0x8e   :  { %87 = vadd.xlane.f32.xlu0 %v86_v10 }
  0xf9   :  { %v85_v18 = vpop.xlane.xlu0 %84 }
  0xfa   :  { %v96_v19 = vmul.f32 %v474_v17, %v85_v18 }
  0xfc   :  { %v98_v20 = vsub.f32 %v76_v6, %v96_v19  ;;  %v361_v19 = vld [vmem:[%s554_s9] sm:$0xff] }
  0xfd   :  { %273 = vmatpush.bf16.msra.mxu2 %v361_v19 }
  0xfe   :  { %v100_v21 = vmul.f32 %v98_v20, %v98_v20 }
 0x100   :  { %v102_v22 = vsel %vm82_vm1, %v100_v21, 0.0 }
 0x101   :  { %103 = vadd.xlane.f32.xlu1 %v102_v22  ;;  %v88_v23 = vpop.xlane.xlu0 %87 }
 0x102   :  { %v97_v24 = vmul.f32 %v474_v17, %v88_v23 }
 0x104   :  { %v99_v25 = vsub.f32 %v78_v9, %v97_v24 }
 0x106   :  { %v101_v26 = vmul.f32 %v99_v25, %v99_v25 }
 0x108   :  { %v105_v27 = vsel %vm82_vm1, %v101_v26, 0.0 }
 0x109   :  { %106 = vadd.xlane.f32.xlu1 %v105_v27 }
 0x174   :  { %v104_v29 = vpop.xlane.xlu1 %103 }
 0x175   :  { %v108_v30 = vmul.f32 %v104_v29, %v474_v17 }
 0x177   :  { %v110_v32 = vadd.f32 1e-05, %v108_v30 }
 0x179   :  { %376 = vrsqrt.f32 %v110_v32  ;;  %vm118_vm4 = vweird.f32 %v110_v32 }
 0x17c   :  { %v107_v33 = vpop.xlane.xlu1 %106 }
 0x17d   :  { %v109_v34 = vmul.f32 %v107_v33, %v474_v17 }
 0x17f   :  { %v377_v35 = vpop.eup %376  ;;  %v111_v36 = vadd.f32 1e-05, %v109_v34 }
 0x180   :  { %v113_v37 = vmul.f32 %v377_v35, %v110_v32  ;;  %vm119_vm3 = vweird.f32 %v377_v35 }
 0x181   :  { %378 = vrsqrt.f32 %v111_v36  ;;  %vm120_vm5 = vmor %vm118_vm4, %vm119_vm3  ;;  %vm128_vm7 = vweird.f32 %v111_v36 }
 0x182   :  { %v114_v38 = vmul.f32 %v377_v35, %v113_v37 }
 0x184   :  { %v115_v39 = vmul.f32 0.5, %v114_v38 }
 0x186   :  { %v116_v40 = vsub.f32 1.5, %v115_v39 }
 0x187   :  { %v379_v41 = vpop.eup %378 }
 0x188   :  { %v117_v42 = vmul.f32 %v377_v35, %v116_v40  ;;  %v123_v43 = vmul.f32 %v379_v41, %v111_v36  ;;  %vm129_vm6 = vweird.f32 %v379_v41  ;;  %v371_v40 = vld [vmem:[%s552_s8] ss:$0 sm:$0xff] }
 0x189   :  { %vm130_vm8 = vmor %vm128_vm7, %vm129_vm6 }
 0x18a   :  { %v121_v44 = vsel %vm120_vm5, %v377_v35, %v117_v42  ;;  %v124_v45 = vmul.f32 %v379_v41, %v123_v43 }
 0x18b   :  { %v132_v47 = vmul.f32 %v121_v44, %v98_v20  ;;  %v363_v20 = vld [vmem:[%s555_s11] sm:$0xff] }
 0x18c   :  { %v125_v46 = vmul.f32 0.5, %v124_v45  ;;  %309 = vmatpush.bf16.msra.mxu3 %v363_v20 }
 0x18d   :  { %v137_v51 = vmul.f32 %v367_v48, %v132_v47 }
 0x18e   :  { %v126_v49 = vsub.f32 1.5, %v125_v46 }
 0x18f   :  { %v142_v56 = vadd.f32 %v368_v52, %v137_v51 }
 0x190   :  { %v127_v50 = vmul.f32 %v379_v41, %v126_v49  ;;  %v372_v49 = vld [vmem:[%s553_s10] ss:$0 sm:$0xff] }
 0x191   :  { %v144_v58 = vmax.f32 %v142_v56, 0.0 }
 0x192   :  { %v131_v53 = vsel %vm130_vm8, %v379_v41, %v127_v50  ;;  %v373_v50 = vld [vmem:[%s556_s12] ss:$0 sm:$0xff] }
 0x193   :  { %v133_v54 = vmul.f32 %v131_v53, %v99_v25 }
 0x195   :  { %v138_v55 = vmul.f32 %v367_v48, %v133_v54 }
 0x197   :  { %v143_v57 = vadd.f32 %v368_v52, %v138_v55 }
 0x199   :  { %v145_v59 = vmax.f32 %v143_v57, 0.0 }
 0x19b   :  { %v146_v60 = vpack.c.bf16 %v145_v59, %v144_v58 }
 0x19d   :  { %339 = vmatmul.msk.bf16.vlgmr.msra.gmra.mxu1 %vm82_vm1, %v146_v60 }
 0x21a   :  { %v179_v62 = vpop.f32.mrf.mxu1 }
 0x21b   :  { %v180_v63 = vadd.f32 %v369_v61, %v179_v62 }
 0x21d   :  { %v186_v0 = vsel %vm82_vm1, %v180_v63, 0.0 }
 0x21e   :  { %187 = vadd.xlane.f32.xlu2 %v186_v0 }
 0x222   :  { %v181_v1 = vpop.f32.mrf.mxu1 }
 0x223   :  { %v182_v2 = vadd.f32 %v369_v61, %v181_v1 }
 0x225   :  { %v189_v3 = vsel %vm82_vm1, %v182_v2, 0.0 }
 0x226   :  { %190 = vadd.xlane.f32.xlu2 %v189_v3 }
 0x291   :  { %v188_v4 = vpop.xlane.xlu2 %187 }
 0x292   :  { %v192_v5 = vmul.f32 %v188_v4, %v474_v17 }
 0x294   :  { %v194_v6 = vsub.f32 %v180_v63, %v192_v5 }
 0x296   :  { %v196_v7 = vmul.f32 %v194_v6, %v194_v6 }
 0x298   :  { %v198_v8 = vsel %vm82_vm1, %v196_v7, 0.0 }
 0x299   :  { %199 = vadd.xlane.f32.xlu0 %v198_v8  ;;  %v191_v9 = vpop.xlane.xlu2 %190 }
 0x29a   :  { %v193_v10 = vmul.f32 %v191_v9, %v474_v17 }
 0x29c   :  { %v195_v11 = vsub.f32 %v182_v2, %v193_v10 }
 0x29e   :  { %v197_v12 = vmul.f32 %v195_v11, %v195_v11 }
 0x2a0   :  { %v201_v13 = vsel %vm82_vm1, %v197_v12, 0.0 }
 0x2a1   :  { %202 = vadd.xlane.f32.xlu1 %v201_v13 }
 0x30c   :  { %v200_v16 = vpop.xlane.xlu0 %199 }
 0x30d   :  { %v204_v18 = vmul.f32 %v200_v16, %v474_v17 }
 0x30f   :  { %v206_v21 = vadd.f32 1e-05, %v204_v18 }
 0x311   :  { %380 = vrsqrt.f32 %v206_v21  ;;  %vm214_vm10 = vweird.f32 %v206_v21 }
 0x314   :  { %v203_v22 = vpop.xlane.xlu1 %202 }
 0x315   :  { %v205_v23 = vmul.f32 %v203_v22, %v474_v17  ;;  %v370_v17 = vld [vmem:[%s551_s7] ss:$0 sm:$0xff] }
 0x317   :  { %v381_v24 = vpop.eup %380  ;;  %v207_v25 = vadd.f32 1e-05, %v205_v23 }
 0x318   :  { %v209_v26 = vmul.f32 %v381_v24, %v206_v21  ;;  %vm215_vm9 = vweird.f32 %v381_v24 }
 0x319   :  { %382 = vrsqrt.f32 %v207_v25  ;;  %vm216_vm11 = vmor %vm214_vm10, %vm215_vm9  ;;  %vm224_vm13 = vweird.f32 %v207_v25 }
 0x31a   :  { %v210_v27 = vmul.f32 %v381_v24, %v209_v26 }
 0x31c   :  { %v211_v28 = vmul.f32 0.5, %v210_v27 }
 0x31e   :  { %v212_v29 = vsub.f32 1.5, %v211_v28 }
 0x31f   :  { %v383_v30 = vpop.eup %382 }
 0x320   :  { %v213_v31 = vmul.f32 %v381_v24, %v212_v29  ;;  %v219_v32 = vmul.f32 %v383_v30, %v207_v25  ;;  %vm225_vm12 = vweird.f32 %v383_v30 }
 0x321   :  { %vm226_vm14 = vmor %vm224_vm13, %vm225_vm12 }
 0x322   :  { %v217_v33 = vsel %vm216_vm11, %v381_v24, %v213_v31  ;;  %v220_v34 = vmul.f32 %v383_v30, %v219_v32 }
 0x323   :  { %v228_v36 = vmul.f32 %v217_v33, %v194_v6 }
 0x324   :  { %v221_v35 = vmul.f32 0.5, %v220_v34 }
 0x325   :  { %v233_v39 = vmul.f32 %v370_v17, %v228_v36 }
 0x326   :  { %v222_v37 = vsub.f32 1.5, %v221_v35 }
 0x327   :  { %v238_v44 = vadd.f32 %v371_v40, %v233_v39 }
 0x328   :  { %v223_v38 = vmul.f32 %v383_v30, %v222_v37 }
 0x329   :  { %v240_v46 = vmax.f32 %v238_v44, 0.0 }
 0x32a   :  { %v227_v41 = vsel %vm226_vm14, %v383_v30, %v223_v38 }
 0x32b   :  { %v229_v42 = vmul.f32 %v227_v41, %v195_v11 }
 0x32d   :  { %v234_v43 = vmul.f32 %v370_v17, %v229_v42 }
 0x32f   :  { %v239_v45 = vadd.f32 %v371_v40, %v234_v43 }
 0x331   :  { %v241_v47 = vmax.f32 %v239_v45, 0.0 }
 0x333   :  { %v242_v48 = vpack.c.bf16 %v241_v47, %v240_v46 }
 0x335   :  { %348 = vmatmul.msk.bf16.vlgmr.msra.gmra.mxu2 %vm82_vm1, %v242_v48  ;;  %357 = vmatmul.msk.bf16.vlgmr.msra.gmra.mxu3 %vm82_vm1, %v242_v48 }
 0x3b8   :  { %v275_v51 = vpop.f32.mrf.mxu2  ;;  %v311_v52 = vpop.f32.mrf.mxu3 }
 0x3b9   :  { %v276_v53 = vadd.f32 %v372_v49, %v275_v51  ;;  %v312_v54 = vadd.f32 %v373_v50, %v311_v52 }
 0x3bb   :  { %280 = vst [vmem:[%s557_s13] sm:$0xff] %v276_v53 }
 0x3bc   :  { %316 = vst [vmem:[%s558_s14] sm:$0xff] %v312_v54 }
 0x3c0   :  { %v277_v55 = vpop.f32.mrf.mxu2  ;;  %v313_v56 = vpop.f32.mrf.mxu3 }
 0x3c1   :  { %v278_v57 = vadd.f32 %v372_v49, %v277_v55  ;;  %v314_v58 = vadd.f32 %v373_v50, %v313_v56 }
 0x3c3   :  { %281 = vst [vmem:[%s557_s13 + $0x8] sm:$0xff] %v278_v57 }
 0x3c4   :  { %317 = vst [vmem:[%s558_s14 + $0x8] sm:$0xff] %v314_v58 }

// kernel: lstm_ensemble_forward.7
= control target key start
LH: loop header
LB: loop body
LE: loop exit
PB: predicated region body
PF: predicated region fallthrough
CT: control target
= control target key end

     0   :  { %vm58_vm0 = vcmask 261120   ;;  %s339_s3 = inlined_call_operand.vmem [shape: bf16[32,128], index: 3, kind: input, shape index: {}]   ;;  %s340_s2 = inlined_call_operand.vmem [shape: bf16[32,128], index: 2, kind: input, shape index: {}]   ;;  %s341_s6 = inlined_call_operand.vmem [shape: bf16[32,128], index: 6, kind: input, shape index: {}]   ;;  %s342_s5 = inlined_call_operand.vmem [shape: bf16[32,128], index: 5, kind: input, shape index: {}]   ;;  %s343_s1 = inlined_call_operand.vmem [shape: f32[16,32], index: 1, kind: input, shape index: {}]   ;;  %s344_s0 = inlined_call_operand.vmem [shape: f32[16,32], index: 0, kind: input, shape index: {}]   ;;  %s345_s4 = inlined_call_operand.vmem [shape: f32[1,128], index: 4, kind: input, shape index: {}]   ;;  %s346_s7 = inlined_call_operand.vmem [shape: f32[1,128], index: 7, kind: input, shape index: {}]   ;;  %s347_s8 = inlined_call_operand.vmem [shape: f32[16,128], index: 8, kind: output, shape index: {0}]   ;;  %s348_s9 = inlined_call_operand.vmem [shape: f32[16,128], index: 9, kind: output, shape index: {1}]  }
   0x1   :  { %v228_v0 = vld [vmem:[%s339_s3 + $0x8] sm:$0xff]  ;;  %v227_v4 = vld [vmem:[%s339_s3] sm:$0xff] }
   0x2   :  { %v226_v1 = vld [vmem:[%s340_s2 + $0x8] sm:$0xff]  ;;  %v225_v5 = vld [vmem:[%s340_s2] sm:$0xff]  ;;  %68 = vmatpush.bf16.msra.mxu0 %v228_v0 }
   0x3   :  { %v232_v2 = vld [vmem:[%s341_s6 + $0x8] sm:$0xff]  ;;  %97 = vmatpush.bf16.msra.mxu1 %v226_v1  ;;  %v231_v6 = vld [vmem:[%s341_s6] sm:$0xff] }
   0x4   :  { %v230_v3 = vld [vmem:[%s342_s5 + $0x8] sm:$0xff]  ;;  %v229_v7 = vld [vmem:[%s342_s5] sm:$0xff]  ;;  %139 = vmatpush.bf16.msra.mxu2 %v232_v2 }
   0x5   :  { %v35_v8 = vld [vmem:[%s343_s1] sm:$0xff]  ;;  %165 = vmatpush.bf16.msra.mxu3 %v230_v3  ;;  %v36_v9 = vld [vmem:[%s343_s1 + $0x8] sm:$0xff] }
   0x6   :  { %v32_v10 = vld [vmem:[%s344_s0] sm:$0xff]  ;;  %v33_v11 = vld [vmem:[%s344_s0 + $0x8] sm:$0xff]  ;;  %v37_v12 = vpack.c.bf16 %v36_v9, %v35_v8  ;;  %69 = vmatpush.bf16.msra.mxu0 %v227_v4 }
   0x7   :  { %v34_v13 = vpack.c.bf16 %v33_v11, %v32_v10  ;;  %98 = vmatpush.bf16.msra.mxu1 %v225_v5  ;;  %v233_v14 = vld [vmem:[%s345_s4] ss:$0 sm:$0xff] }
   0x8   :  { %140 = vmatpush.bf16.msra.mxu2 %v231_v6  ;;  %v234_v19 = vld [vmem:[%s346_s7] ss:$0 sm:$0xff] }
   0x9   :  { %166 = vmatpush.bf16.msra.mxu3 %v229_v7  ;;  %197 = vmatmul.msk.bf16.vlgmr.msra.gmra.mxu0 %vm58_vm0, %v37_v12 }
   0xa   :  { %206 = vmatmul.msk.bf16.vlgmr.msra.gmra.mxu1 %vm58_vm0, %v34_v13 }
   0xb   :  { %215 = vmatmul.msk.bf16.vlgmr.msra.gmra.mxu2 %vm58_vm0, %v37_v12 }
   0xc   :  { %224 = vmatmul.msk.bf16.vlgmr.msra.gmra.mxu3 %vm58_vm0, %v34_v13 }
  0x86   :  { %v71_v15 = vpop.f32.mrf.mxu0 }
  0x87   :  { %v100_v16 = vpop.f32.mrf.mxu1 }
  0x88   :  { %v101_v17 = vadd.f32 %v100_v16, %v71_v15 }
  0x8a   :  { %v109_v18 = vadd.f32 %v233_v14, %v101_v17 }
  0x8c   :  { %111 = vst [vmem:[%s347_s8] sm:$0xff] %v109_v18 }
  0x8e   :  { %v142_v20 = vpop.f32.mrf.mxu2  ;;  %v73_v23 = vpop.f32.mrf.mxu0 }
  0x8f   :  { %v168_v21 = vpop.f32.mrf.mxu3  ;;  %v102_v24 = vpop.f32.mrf.mxu1 }
  0x90   :  { %v169_v22 = vadd.f32 %v168_v21, %v142_v20  ;;  %v103_v25 = vadd.f32 %v102_v24, %v73_v23 }
  0x92   :  { %v177_v26 = vadd.f32 %v234_v19, %v169_v22  ;;  %v110_v27 = vadd.f32 %v233_v14, %v103_v25 }
  0x94   :  { %179 = vst [vmem:[%s348_s9] sm:$0xff] %v177_v26 }
  0x95   :  { %112 = vst [vmem:[%s347_s8 + $0x8] sm:$0xff] %v110_v27 }
  0x96   :  { %v144_v28 = vpop.f32.mrf.mxu2 }
  0x97   :  { %v170_v29 = vpop.f32.mrf.mxu3 }
  0x98   :  { %v171_v30 = vadd.f32 %v170_v29, %v144_v28 }
  0x9a   :  { %v178_v31 = vadd.f32 %v234_v19, %v171_v30 }
  0x9c   :  { %180 = vst [vmem:[%s348_s9 + $0x8] sm:$0xff] %v178_v31 }

// kernel: lstm_ensemble_forward.9
= control target key start
LH: loop header
LB: loop body
LE: loop exit
PB: predicated region body
PF: predicated region fallthrough
CT: control target
= control target key end

     0   :  { %s1470_s24 = smov 0   ;;  %s1919_s0 = inlined_call_operand.vmem [shape: f32[8,2,32], index: 0, kind: input, shape index: {}]   ;;  %s1920_s1 = inlined_call_operand.vmem [shape: f32[8,2,32], index: 1, kind: input, shape index: {}]   ;;  %s1921_s2 = inlined_call_operand.vmem [shape: bf16[32,128], index: 2, kind: input, shape index: {}]   ;;  %s1922_s3 = inlined_call_operand.vmem [shape: bf16[32,128], index: 3, kind: input, shape index: {}]   ;;  %s1923_s7 = inlined_call_operand.vmem [shape: bf16[256,32], index: 7, kind: input, shape index: {}]   ;;  %s1924_s8 = inlined_call_operand.vmem [shape: f32[1,32], index: 8, kind: input, shape index: {}]   ;;  %s1925_s9 = inlined_call_operand.vmem [shape: f32[1,32], index: 9, kind: input, shape index: {}]   ;;  %s1926_s10 = inlined_call_operand.vmem [shape: f32[1,32], index: 10, kind: input, shape index: {}]   ;;  %s1927_s11 = inlined_call_operand.vmem [shape: bf16[32,16], index: 11, kind: input, shape index: {}]   ;;  %s1928_s12 = inlined_call_operand.vmem [shape: f32[1,16], index: 12, kind: input, shape index: {}]   ;;  %s1929_s13 = inlined_call_operand.vmem [shape: f32[1,16], index: 13, kind: input, shape index: {}]   ;;  %s1930_s14 = inlined_call_operand.vmem [shape: f32[1,16], index: 14, kind: input, shape index: {}]   ;;  %s1931_s15 = inlined_call_operand.vmem [shape: f32[1,16], index: 15, kind: input, shape index: {}]   ;;  %s1932_s16 = inlined_call_operand.<no memory space> [shape: f32[1,1], index: 16, kind: input, shape index: {}]   ;;  %s1933_s17 = inlined_call_operand.vmem [shape: f32[2,1], index: 17, kind: output, shape index: {}]   ;;  %s1934_s4 = inlined_call_operand.vmem [shape: f32[1,128], index: 4, kind: input, shape index: {}]   ;;  %s1935_s5 = inlined_call_operand.vmem [shape: bf16[128,4], index: 5, kind: input, shape index: {}]   ;;  %s1936_s6 = inlined_call_operand.vmem [shape: f32[1,4], index: 6, kind: input, shape index: {}]  }
   0x1   :  { %1939 = sst [smem:[#allocation5_spill]] %s1919_s0  ;;  %v22_v0 = vstv %s1932_s16  ;;  %v1349_v1 = vld [vmem:[%s1921_s2] sm:$0xf]  ;;  %v1354_v2 = vld [vmem:[%s1921_s2] sm:$0xf0] }
   0x2   :  { %1940 = sst [smem:[#allocation6_spill]] %s1920_s1  ;;  %v1359_v3 = vld [vmem:[%s1921_s2 + $0x8] sm:$0xf]  ;;  %23 = vst [vmem:[#allocation4] sm:$0x1] %v22_v0 }
   0x3   :  { %v1364_v4 = vld [vmem:[%s1921_s2 + $0x8] sm:$0xf0]  ;;  %v1369_v5 = vld [vmem:[%s1922_s3] sm:$0xf]  ;;  %v1374_v6 = vld [vmem:[%s1922_s3] sm:$0xf0] }
   0x4   :  { %v1379_v7 = vld [vmem:[%s1922_s3 + $0x8] sm:$0xf]  ;;  %v1384_v8 = vld [vmem:[%s1922_s3 + $0x8] sm:$0xf0]  ;;  %v1389_v9 = vld [vmem:[%s1934_s4] sm:$0x1] }
   0x5   :  { %v1394_v10 = vld [vmem:[%s1935_s5] sm:$0xf]  ;;  %v1399_v11 = vld [vmem:[%s1935_s5] sm:$0xf0]  ;;  %v1404_v12 = vld [vmem:[%s1935_s5 + $0x8] sm:$0xf] }
   0x6   :  { %v1409_v13 = vld [vmem:[%s1935_s5 + $0x8] sm:$0xf0]  ;;  %v1414_v14 = vld [vmem:[%s1935_s5 + $0x10] sm:$0xf]  ;;  %v1419_v15 = vld [vmem:[%s1935_s5 + $0x10] sm:$0xf0] }
   0x7   :  { %v1424_v16 = vld [vmem:[%s1935_s5 + $0x18] sm:$0xf]  ;;  %v1429_v17 = vld [vmem:[%s1935_s5 + $0x18] sm:$0xf0]  ;;  %v1434_v18 = vld [vmem:[%s1935_s5 + $0x20] sm:$0xf] }
   0x8   :  { %v1439_v19 = vld [vmem:[%s1935_s5 + $0x20] sm:$0xf0]  ;;  %v1444_v20 = vld [vmem:[%s1935_s5 + $0x28] sm:$0xf]  ;;  %v1449_v21 = vld [vmem:[%s1935_s5 + $0x28] sm:$0xf0] }
   0x9   :  { %v1454_v22 = vld [vmem:[%s1935_s5 + $0x30] sm:$0xf]  ;;  %v1459_v23 = vld [vmem:[%s1935_s5 + $0x30] sm:$0xf0]  ;;  %v1050_v24 = vld [vmem:[%s1935_s5 + $0x38] sm:$0xf] }
   0xa   :  { %v1136_v25 = vld [vmem:[%s1935_s5 + $0x38] sm:$0xf0]  ;;  %v84_v26 = vld [vmem:[%s1936_s6] sm:$0x1] }
   0xb LB: > { %v1009_v27 = vor.u32 %v1384_v8, %v1379_v7  ;;  %v1018_v28 = vor.u32 %v1364_v4, %v1359_v3  ;;  %v1051_v29 = vor.u32 %v1136_v25, %v1050_v24  ;;  %v1005_v30 = vor.u32 %v1374_v6, %v1369_v5  ;;  %s1484_s5 = sshll.u32 %s1242_s24, 1  ;;  %s1941_s2 = sld [smem:[#allocation6_spill]]  ;;  %s1242_s24 = sphi %s1470_s24, %s90_s24  }
   0xc   : > { %v1014_v31 = vor.u32 %v1354_v2, %v1349_v1  ;;  %s1942_s29 = sld [smem:[#allocation5_spill]]  ;;  %v1047_v32 = vor.u32 %v1459_v23, %v1454_v22  ;;  %vm110_vm0 = vcmask 261120   ;;  %v1043_v37 = vor.u32 %v1449_v21, %v1444_v20  ;;  %s225_s30 = scalar_lea.vmem [#allocation2], %s1484_s5 }
   0xd   : > { %120 = vmatpush.bf16.msra.mxu0 %v1009_v27  ;;  %148 = vmatpush.bf16.msra.mxu1 %v1018_v28  ;;  %v1039_v38 = vor.u32 %v1439_v19, %v1434_v18  ;;  %v1035_v39 = vor.u32 %v1429_v17, %v1424_v16  ;;  %v1031_v40 = vor.u32 %v1419_v15, %v1414_v14  ;;  %v156_v43 = vperm.slane %v1389_v9, 0  ;;  %s90_s24 = sadd.s32 1, %s1242_s24  }
   0xe   : > { %212 = vmatpush.bf16.msra.mxu2 %v1051_v29  ;;  %v1027_v41 = vor.u32 %v1409_v13, %v1404_v12  ;;  %v1023_v42 = vor.u32 %v1399_v11, %v1394_v10  ;;  %v162_v52 = vperm.slane %v84_v26, 0  ;;  %vm226_vm1 = vcmask 25600   ;;  %p87_p0 = scmp.ge.s32.totalorder %s90_s24, 8  }
   0xf   :  { %v1244_v57 = vmov (%p87_p0), 3   ;;  %v1245_v58 = vmov (%p87_p0), 2   ;;  %v1246_v62 = vmov (%p87_p0), 1   ;;  %s1943_s19 = sld [smem:[#allocation5_spill]] (%p87_p0)  ;;  %vm377_vm6 = vcmask (%p87_p0), 254976  }
  0x10   :  { %1176 = vset.pattern.permute.xlu0 (%p87_p0), %v1244_v57  ;;  %1174 = vset.pattern.permute.xlu1 (%p87_p0), %v1245_v58  ;;  %s1944_s1 = sld [smem:[#allocation6_spill]] (%p87_p0)  ;;  %vm421_vm7 = vcmask (%p87_p0), 517376   ;;  %vm482_vm8 = vcmask (%p87_p0), 779776   ;;  %vm511_vm9 = vcmask (%p87_p0), 1042176   ;;  %vm932_vm14 = vcmask (%p87_p0), 123904  }
  0x11   : > { %s95_s26 = scalar_lea.vmem %s1941_s2, %s1484_s5  ;;  %121 = vmatpush.bf16.msra.mxu0 %v1005_v30  ;;  %149 = vmatpush.bf16.msra.mxu1 %v1014_v31 }
  0x12   : > { %s92_s0 = scalar_lea.vmem %s1942_s29, %s1484_s5  ;;  %v96_v33 = vld [vmem:[%s95_s26] sm:$0x3]  ;;  %213 = vmatpush.bf16.msra.mxu2 %v1047_v32  ;;  %1175 = vset.pattern.permute.xlu2 (%p87_p0), %v1246_v62  ;;  %s1250_s26 = smov (%p87_p0), 96  }
  0x13   : > { %v93_v34 = vld [vmem:[%s92_s0] sm:$0x3]  ;;  %v97_v35 = vpack.c.bf16 %v96_v33, %v96_v33 }
  0x14   : > { %v94_v36 = vpack.c.bf16 %v93_v34, %v93_v34 }
  0x15   : > { %1010 = vmatmul.msk.bf16.vlgmr.msra.gmra.mxu0 %vm110_vm0, %v97_v35 }
  0x16   : > { %1019 = vmatmul.msk.bf16.vlgmr.msra.gmra.mxu1 %vm110_vm0, %v94_v36  ;;  %214 = vmatpush.bf16.msra.mxu2 %v1043_v37 }
  0x1a   : > { %215 = vmatpush.bf16.msra.mxu2 %v1039_v38 }
  0x1e   : > { %216 = vmatpush.bf16.msra.mxu2 %v1035_v39 }
  0x22   : > { %217 = vmatpush.bf16.msra.mxu2 %v1031_v40 }
  0x26   : > { %218 = vmatpush.bf16.msra.mxu2 %v1027_v41 }
  0x2a   : > { %219 = vmatpush.bf16.msra.mxu2 %v1023_v42 }
  0x92   : > { %v123_v44 = vpop.f32.mrf.mxu0 }
  0x93   : > { %v151_v45 = vpop.f32.mrf.mxu1 }
  0x94   : > { %v152_v46 = vadd.f32 %v151_v45, %v123_v44 }
  0x96   : > { %v158_v47 = vadd.f32 %v156_v43, %v152_v46 }
  0x98   : > { %1172 = vtanh.f32 %v158_v47 }
  0x9a   : > { %v125_v48 = vpop.f32.mrf.mxu0 }
  0x9b   : > { %v153_v49 = vpop.f32.mrf.mxu1 }
  0x9e   : > { %v1173_v50 = vpop.eup %1172 }
  0x9f   : > { %v160_v51 = vpack.c.bf16 %v1173_v50, %v1173_v50 }
  0xa1   : > { %220 = vmatmul.bf16.vlgmr.msra.gmra.mxu2 %v160_v51 }
 0x124   : > { %v221_v53 = vpop.f32.mrf.mxu2 }
 0x125   : > { %v222_v54 = vadd.f32 %v221_v53, %v162_v52 }
 0x127   : > { %227 = vst.msk [vmem:[%s225_s30] sm:$0x3] %vm226_vm1, %v222_v54 }
 0x128   :  { %89 = sbr.rel (!%p87_p0) target bundleno = 11 (0xb), region = 98 }
 0x12c   : > { %v223_v55 = vpop.f32.mrf.mxu2 }
 0x12e   :  { %v228_v56 = vld [vmem:[#allocation2] sm:$0x3]  ;;  %v229_v59 = vld [vmem:[#allocation2 + $0x2] sm:$0x3]  ;;  %v230_v60 = vld [vmem:[#allocation2 + $0x4] sm:$0x3] }
 0x12f   :  { %v231_v61 = vld [vmem:[#allocation2 + $0x6] sm:$0x3]  ;;  %v232_v63 = vld [vmem:[#allocation2 + $0x8] sm:$0x3]  ;;  %v233_v0 = vld [vmem:[#allocation2 + $0xa] sm:$0x3] }
 0x130   :  { %v234_v27 = vld [vmem:[#allocation2 + $0xc] sm:$0x3]  ;;  %v235_v28 = vld [vmem:[#allocation2 + $0xe] sm:$0x3]  ;;  %v237_v29 = vsel %vm226_vm1, %v228_v56, -inf  ;;  %v238_v1 = vsel %vm226_vm1, %v229_v59, -inf }
 0x131   :  { %v239_v2 = vsel %vm226_vm1, %v230_v60, -inf  ;;  %v240_v3 = vsel %vm226_vm1, %v231_v61, -inf  ;;  %v241_v4 = vsel %vm226_vm1, %v232_v63, -inf  ;;  %v243_v5 = vsel %vm226_vm1, %v233_v0, -inf }
 0x132   :  { %v245_v6 = vsel %vm226_vm1, %v234_v27, -inf  ;;  %v247_v7 = vsel %vm226_vm1, %v235_v28, -inf  ;;  %v242_v8 = vmax.f32 %v237_v29, %v241_v4  ;;  %v244_v9 = vmax.f32 %v238_v1, %v243_v5 }
 0x133   :  { %v246_v10 = vmax.f32 %v239_v2, %v245_v6  ;;  %v248_v11 = vmax.f32 %v240_v3, %v247_v7  ;;  %v1247_v7 = vmov 0  }
 0x134   :  { %v249_v12 = vmax.f32 %v242_v8, %v244_v9 }
 0x135   :  { %v250_v13 = vmax.f32 %v246_v10, %v248_v11 }
 0x137   :  { %v251_v14 = vmax.f32 %v249_v12, %v250_v13  ;;  %v1559_v13 = vld [vmem:[%s1943_s19] sm:$0x3] }
 0x139   :  { %v252_v15 = vsub.f32 %v228_v56, %v251_v14  ;;  %v253_v16 = vsub.f32 %v229_v59, %v251_v14  ;;  %v254_v17 = vsub.f32 %v230_v60, %v251_v14  ;;  %v255_v18 = vsub.f32 %v231_v61, %v251_v14 }
 0x13a   :  { %v256_v19 = vsub.f32 %v232_v63, %v251_v14  ;;  %v257_v20 = vsub.f32 %v233_v0, %v251_v14  ;;  %v258_v24 = vsub.f32 %v234_v27, %v251_v14  ;;  %v259_v30 = vsub.f32 %v235_v28, %v251_v14  ;;  %v1564_v14 = vld [vmem:[%s1944_s1] sm:$0x3] }
 0x13b   :  { %v260_v21 = vmul.f32 1.442695, %v252_v15  ;;  %v262_v22 = vmul.f32 1.442695, %v253_v16  ;;  %v264_v23 = vmul.f32 1.442695, %v254_v17 }
 0x13c   :  { %v266_v25 = vmul.f32 1.442695, %v255_v18  ;;  %v268_v26 = vmul.f32 1.442695, %v256_v19  ;;  %v270_v31 = vmul.f32 1.442695, %v257_v20 }
 0x13d   :  { %1210 = vpow2.f32 %v260_v21  ;;  %v272_v32 = vmul.f32 1.442695, %v258_v24  ;;  %v274_v33 = vmul.f32 1.442695, %v259_v30  ;;  %v1571_v16 = vld [vmem:[%s1943_s19 + $0x2] sm:$0x3] }
 0x13e   :  { %1212 = vpow2.f32 %v262_v22  ;;  %v1576_v17 = vld [vmem:[%s1944_s1 + $0x2] sm:$0x3] }
 0x13f   :  { %1214 = vpow2.f32 %v264_v23 }
 0x140   :  { %1216 = vpow2.f32 %v266_v25 }
 0x141   :  { %1218 = vpow2.f32 %v268_v26 }
 0x142   :  { %1220 = vpow2.f32 %v270_v31 }
 0x143   :  { %v1211_v34 = vpop.eup %1210  ;;  %1222 = vpow2.f32 %v272_v32 }
 0x144   :  { %v1213_v35 = vpop.eup %1212  ;;  %v276_v36 = vsel %vm226_vm1, %v1211_v34, 0.0  ;;  %1224 = vpow2.f32 %v274_v33 }
 0x145   :  { %v1215_v37 = vpop.eup %1214  ;;  %v277_v38 = vsel %vm226_vm1, %v1213_v35, 0.0 }
 0x146   :  { %v1217_v39 = vpop.eup %1216  ;;  %v278_v40 = vadd.f32 %v277_v38, %v276_v36  ;;  %v279_v41 = vsel %vm226_vm1, %v1215_v37, 0.0 }
 0x147   :  { %v1219_v42 = vpop.eup %1218  ;;  %v281_v43 = vsel %vm226_vm1, %v1217_v39, 0.0 }
 0x148   :  { %v1221_v44 = vpop.eup %1220  ;;  %v280_v45 = vadd.f32 %v279_v41, %v278_v40  ;;  %v283_v46 = vsel %vm226_vm1, %v1219_v42, 0.0 }
 0x149   :  { %v1223_v47 = vpop.eup %1222  ;;  %v285_v49 = vsel %vm226_vm1, %v1221_v44, 0.0 }
 0x14a   :  { %v282_v48 = vadd.f32 %v281_v43, %v280_v45  ;;  %v1533_v50 = vpop.eup %1224  ;;  %v287_v52 = vsel %vm226_vm1, %v1223_v47, 0.0 }
 0x14b   :  { %v289_v54 = vsel %vm226_vm1, %v1533_v50, 0.0 }
 0x14c   :  { %v284_v51 = vadd.f32 %v283_v46, %v282_v48 }
 0x14e   :  { %v286_v53 = vadd.f32 %v285_v49, %v284_v51 }
 0x150   :  { %v288_v55 = vadd.f32 %v287_v52, %v286_v53 }
 0x152   :  { %v290_v56 = vadd.f32 %v289_v54, %v288_v55 }
 0x154   :  { %1226 = vrcp.f32 %v290_v56  ;;  %v302_v61 = vand.u32 2147483648, %v290_v56  ;;  %vm296_vm2 = vweird.f32 %v290_v56  ;;  %v300_v0 = vand.u32 2147483647, %v290_v56 }
 0x156   :  { %v303_v28 = vor.u32 1.1754944e-38, %v302_v61  ;;  %vm301_vm5 = vcmp.eq.f32.partialorder %v300_v0, 8.507059e+37 }
 0x15a   :  { %v1227_v59 = vpop.eup %1226 }
 0x15b   :  { %v292_v60 = vmul.f32 %v1227_v59, %v290_v56  ;;  %vm297_vm3 = vweird.f32 %v1227_v59 }
 0x15c   :  { %vm298_vm4 = vmor %vm296_vm2, %vm297_vm3  ;;  %vm984_vm3 = vcmask 1024  }
 0x15d   :  { %v293_v63 = vsub.f32 1.0, %v292_v60 }
 0x15f   :  { %v294_v27 = vmul.f32 %v1227_v59, %v293_v63 }
 0x161   :  { %v295_v29 = vadd.f32 %v1227_v59, %v294_v27 }
 0x163   :  { %v299_v1 = vsel %vm298_vm4, %v1227_v59, %v295_v29 }
 0x164   :  { %v304_v2 = vsel %vm301_vm5, %v303_v28, %v299_v1 }
 0x165   :  { %v305_v3 = vmul.f32 %v1211_v34, %v304_v2  ;;  %v307_v4 = vmul.f32 %v1215_v37, %v304_v2  ;;  %v306_v5 = vmul.f32 %v1213_v35, %v304_v2  ;;  %v308_v6 = vmul.f32 %v1217_v39, %v304_v2 }
 0x166   :  { %v309_v8 = vmul.f32 %v1219_v42, %v304_v2  ;;  %v310_v9 = vmul.f32 %v1221_v44, %v304_v2  ;;  %v311_v10 = vmul.f32 %v1223_v47, %v304_v2  ;;  %v312_v11 = vmul.f32 %v1533_v50, %v304_v2 }
 0x167   :  { %598 = vperm.xlu0 %1176, %v305_v3   ;;  %424 = vperm.xlu2 %1175, %v305_v3  }
 0x168   :  { %514 = vperm.xlu1 %1174, %v305_v3  }
 0x16f   :  { %606 = vperm.xlu0 %1176, %v307_v4   ;;  %428 = vperm.xlu2 %1175, %v306_v5  }
 0x170   :  { %518 = vperm.xlu1 %1174, %v306_v5  }
 0x177   :  { %1183 = vset.pattern.permute.xlu0 %v1246_v62  ;;  %1178 = vset.pattern.permute.xlu2 %v1247_v7 }
 0x178   :  { %1177 = vset.pattern.permute.xlu1 %v1244_v57  ;;  %436 = vperm.xlu0 %1183, %v308_v6  }
 0x179   :  { %341 = vperm.xlu2 %1178, %v307_v4   ;;  %602 = vperm.xlu1 %1177, %v306_v5  }
 0x180   :  { %1188 = vset.pattern.permute.xlu0 %v1244_v57 }
 0x181   :  { %1180 = vset.pattern.permute.xlu2 %v1246_v62  ;;  %1179 = vset.pattern.permute.xlu1 %v1245_v58 }
 0x182   :  { %614 = vperm.xlu0 %1188, %v309_v8   ;;  %432 = vperm.xlu2 %1180, %v307_v4  }
 0x183   :  { %522 = vperm.xlu1 %1179, %v307_v4  }
 0x18a   :  { %1189 = vset.pattern.permute.xlu0 %v1247_v7  ;;  %1182 = vset.pattern.permute.xlu2 %v1245_v58 }
 0x18b   :  { %1181 = vset.pattern.permute.xlu1 %v1247_v7  ;;  %331 = vperm.xlu0 %1189, %v305_v3  }
 0x18c   :  { %526 = vperm.xlu2 %1182, %v308_v6   ;;  %346 = vperm.xlu1 %1181, %v308_v6  }
 0x193   :  { %336 = vperm.xlu0 %1189, %v306_v5  }
 0x194   :  { %1185 = vset.pattern.permute.xlu2 %v1247_v7  ;;  %1184 = vset.pattern.permute.xlu1 %v1244_v57 }
 0x195   :  { %351 = vperm.xlu2 %1185, %v309_v8   ;;  %610 = vperm.xlu1 %1184, %v308_v6  }
 0x19b   :  { %361 = vperm.xlu0 %1189, %v311_v10  }
 0x19d   :  { %1187 = vset.pattern.permute.xlu2 %v1246_v62  ;;  %1186 = vset.pattern.permute.xlu1 %v1245_v58 }
 0x19e   :  { %440 = vperm.xlu2 %1187, %v309_v8   ;;  %530 = vperm.xlu1 %1186, %v309_v8  }
 0x1a3   :  { %1198 = vset.pattern.permute.xlu0 %v1245_v58 }
 0x1a4   :  { %542 = vperm.xlu0 %1198, %v312_v11  }
 0x1a6   :  { %1190 = vset.pattern.permute.xlu1 %v1247_v7  ;;  %1191 = vset.pattern.permute.xlu2 %v1245_v58 }
 0x1a7   :  { %356 = vperm.xlu1 %1190, %v310_v9   ;;  %534 = vperm.xlu2 %1191, %v310_v9  }
 0x1ac   :  { %1201 = vset.pattern.permute.xlu0 %v1244_v57 }
 0x1af   :  { %1192 = vset.pattern.permute.xlu1 %v1246_v62  ;;  %1193 = vset.pattern.permute.xlu2 %v1244_v57 }
 0x1b0   :  { %444 = vperm.xlu1 %1192, %v310_v9   ;;  %618 = vperm.xlu2 %1193, %v310_v9  }
 0x1b8   :  { %1194 = vset.pattern.permute.xlu1 %v1245_v58  ;;  %1195 = vset.pattern.permute.xlu2 %v1246_v62 }
 0x1b9   :  { %538 = vperm.xlu1 %1194, %v311_v10   ;;  %448 = vperm.xlu2 %1195, %v311_v10  }
 0x1c1   :  { %1196 = vset.pattern.permute.xlu1 %v1244_v57  ;;  %1197 = vset.pattern.permute.xlu2 %v1247_v7  ;;  %v425_v12 = vpop.permute.xlu2 %424 }
 0x1c2   :  { %622 = vperm.xlu1 %1196, %v311_v10   ;;  %366 = vperm.xlu2 %1197, %v312_v11   ;;  %v455_v58 = vmul.f32 %v425_v12, %v1559_v13  ;;  %v484_v15 = vmul.f32 %v425_v12, %v1564_v14  ;;  %v1654_v12 = vld [vmem:[%s1943_s19 + $0x6] sm:$0x3] }
 0x1c4   :  { %v463_v19 = vsel %vm377_vm6, %v455_v58, 0.0  ;;  %v492_v20 = vsel %vm377_vm6, %v484_v15, 0.0  ;;  %v1659_v58 = vld [vmem:[%s1944_s1 + $0x6] sm:$0x3] }
 0x1c9   :  { %v429_v18 = vpop.permute.xlu2 %428 }
 0x1ca   :  { %1199 = vset.pattern.permute.xlu1 %v1246_v62  ;;  %v456_v21 = vmul.f32 %v429_v18, %v1571_v16  ;;  %v485_v22 = vmul.f32 %v429_v18, %v1576_v17  ;;  %1200 = vset.pattern.permute.xlu2 %v1244_v57  ;;  %v1591_v62 = vld [vmem:[%s1943_s19 + $0x4] sm:$0x3] }
 0x1cb   :  { %452 = vperm.xlu1 %1199, %v312_v11   ;;  %626 = vperm.xlu2 %1200, %v312_v11   ;;  %v1596_v57 = vld [vmem:[%s1944_s1 + $0x4] sm:$0x3] }
 0x1cc   :  { %v464_v23 = vsel %vm377_vm6, %v456_v21, 0.0  ;;  %v493_v24 = vsel %vm377_vm6, %v485_v22, 0.0  ;;  %v1668_v21 = vld [vmem:[%s1943_s19 + $0x8] sm:$0x3] }
 0x1cd   :  { %v465_v25 = vadd.f32 %v464_v23, %v463_v19  ;;  %v494_v26 = vadd.f32 %v493_v24, %v492_v20  ;;  %v1673_v22 = vld [vmem:[%s1944_s1 + $0x8] sm:$0x3] }
 0x1d3   :  { %v342_v30 = vpop.permute.xlu2 %341 }
 0x1d4   :  { %v371_v7 = vmul.f32 %v342_v30, %v1591_v62  ;;  %v396_v8 = vmul.f32 %v342_v30, %v1596_v57 }
 0x1d6   :  { %v381_v15 = vsel %vm377_vm6, %v371_v7, 0.0  ;;  %v405_v18 = vsel %vm377_vm6, %v396_v8, 0.0 }
 0x1d9   :  { %v1586_v31 = vpop.permute.xlu0 %598 }
 0x1da   :  { %v1598_v32 = vpop.permute.xlu1 %514  ;;  %v657_v43 = vmul.f32 %v1586_v31, %v1564_v14 }
 0x1dc   :  { %v433_v33 = vpop.permute.xlu2 %432  ;;  %v665_v46 = vsel %vm377_vm6, %v657_v43, 0.0 }
 0x1dd   :  { %v457_v34 = vmul.f32 %v433_v33, %v1591_v62  ;;  %v486_v35 = vmul.f32 %v433_v33, %v1596_v57  ;;  %v545_v33 = vmul.f32 %v1598_v32, %v1559_v13 }
 0x1df   :  { %v466_v36 = vsel %vm377_vm6, %v457_v34, 0.0  ;;  %v495_v37 = vsel %vm377_vm6, %v486_v35, 0.0  ;;  %v1684_v34 = vld [vmem:[%s1943_s19 + $0xc] sm:$0x3] }
 0x1e0   :  { %v1604_v38 = vadd.f32 %v466_v36, %v465_v25  ;;  %v1606_v39 = vadd.f32 %v495_v37, %v494_v26  ;;  %v1689_v35 = vld [vmem:[%s1944_s1 + $0xc] sm:$0x3] }
 0x1e1   :  { %v1610_v41 = vpop.permute.xlu0 %606 }
 0x1e2   :  { %v1608_v40 = vpop.permute.xlu1 %518  ;;  %v659_v44 = vmul.f32 %v1610_v41, %v1596_v57 }
 0x1e4   :  { %v668_v49 = vsel %vm377_vm6, %v659_v44, 0.0 }
 0x1e6   :  { %v1612_v42 = vpop.permute.xlu2 %526 }
 0x1ea   :  { %v1621_v47 = vpop.permute.xlu0 %436 }
 0x1eb   :  { %v1618_v45 = vpop.permute.xlu1 %602 }
 0x1ec   :  { %v658_v48 = vmul.f32 %v1618_v45, %v1576_v17 }
 0x1ee   :  { %v666_v50 = vsel %vm377_vm6, %v658_v48, 0.0 }
 0x1ef   :  { %v667_v51 = vadd.f32 %v666_v50, %v665_v46  ;;  %v352_v52 = vpop.permute.xlu2 %351 }
 0x1f0   :  { %v373_v26 = vmul.f32 %v352_v52, %v1668_v21  ;;  %v398_v30 = vmul.f32 %v352_v52, %v1673_v22  ;;  %v553_v52 = vsel %vm377_vm6, %v545_v33, 0.0 }
 0x1f1   :  { %v1627_v53 = vadd.f32 %v668_v49, %v667_v51 }
 0x1f2   :  { %v385_v48 = vsel %vm377_vm6, %v373_v26, 0.0  ;;  %v409_v49 = vsel %vm377_vm6, %v398_v30, 0.0 }
 0x1f4   :  { %v1629_v54 = vpop.permute.xlu0 %614 }
 0x1f5   :  { %v523_v55 = vpop.permute.xlu1 %522 }
 0x1f8   :  { %v1631_v56 = vpop.permute.xlu2 %440 }
 0x1fd   :  { %v332_v59 = vpop.permute.xlu0 %331 }
 0x1fe   :  { %v347_v60 = vpop.permute.xlu1 %346  ;;  %v369_v27 = vmul.f32 %v332_v59, %v1559_v13  ;;  %v394_v28 = vmul.f32 %v332_v59, %v1564_v14  ;;  %v569_v59 = vmul.f32 %v1598_v32, %v1564_v14  ;;  %v570_v14 = vmul.f32 %v1608_v40, %v1576_v17 }
 0x1ff   :  { %v372_v19 = vmul.f32 %v347_v60, %v1654_v12  ;;  %v397_v20 = vmul.f32 %v347_v60, %v1659_v58  ;;  %v629_v60 = vmul.f32 %v1586_v31, %v1559_v13  ;;  %v1721_v31 = vld [vmem:[%s1943_s19 + $0xe] sm:$0x3] }
 0x200   :  { %v378_v3 = vsel %vm377_vm6, %v369_v27, 0.0  ;;  %v402_v4 = vsel %vm377_vm6, %v394_v28, 0.0  ;;  %v1710_v27 = vld [vmem:[%s1944_s1 + $0xa] sm:$0x3] }
 0x201   :  { %v1633_v61 = vpop.permute.xlu2 %534  ;;  %v383_v37 = vsel %vm377_vm6, %v372_v19, 0.0  ;;  %v407_v43 = vsel %vm377_vm6, %v397_v20, 0.0  ;;  %v577_v20 = vsel %vm377_vm6, %v569_v59, 0.0 }
 0x205   :  { %v337_v63 = vpop.permute.xlu0 %336 }
 0x206   :  { %v370_v29 = vmul.f32 %v337_v63, %v1571_v16  ;;  %v395_v1 = vmul.f32 %v337_v63, %v1576_v17  ;;  %v1705_v63 = vld [vmem:[%s1943_s19 + $0xa] sm:$0x3]  ;;  %s1248_s19 = smov 32  }
 0x207   :  { %v1635_v0 = vpop.permute.xlu1 %610 }
 0x208   :  { %v379_v5 = vsel %vm377_vm6, %v370_v29, 0.0  ;;  %v403_v6 = vsel %vm377_vm6, %v395_v1, 0.0  ;;  %v546_v29 = vmul.f32 %v1608_v40, %v1571_v16  ;;  %v1726_v1 = vld [vmem:[%s1944_s1 + $0xe] sm:$0x3]  ;;  %s1249_s1 = smov 64  }
 0x209   :  { %v380_v9 = vadd.f32 %v379_v5, %v378_v3  ;;  %v404_v10 = vadd.f32 %v403_v6, %v402_v4  ;;  %v547_v3 = vmul.f32 %v523_v55, %v1591_v62  ;;  %v571_v4 = vmul.f32 %v523_v55, %v1596_v57 }
 0x20a   :  { %v1641_v2 = vpop.permute.xlu2 %618  ;;  %v554_v57 = vsel %vm377_vm6, %v546_v29, 0.0  ;;  %v578_v55 = vsel %vm377_vm6, %v570_v14, 0.0 }
 0x20b   :  { %v382_v23 = vadd.f32 %v381_v15, %v380_v9  ;;  %v406_v24 = vadd.f32 %v405_v18, %v404_v10 }
 0x20d   :  { %v362_v36 = vpop.permute.xlu0 %361  ;;  %v384_v44 = vadd.f32 %v383_v37, %v382_v23  ;;  %v408_v46 = vadd.f32 %v407_v43, %v406_v24  ;;  %v548_v23 = vmul.f32 %v1612_v42, %v1654_v12  ;;  %v630_v37 = vmul.f32 %v1618_v45, %v1571_v16 }
 0x20e   :  { %v375_v50 = vmul.f32 %v362_v36, %v1684_v34  ;;  %v400_v51 = vmul.f32 %v362_v36, %v1689_v35  ;;  %v572_v36 = vmul.f32 %v1612_v42, %v1659_v58  ;;  %v556_v43 = vsel %vm377_vm6, %v547_v3, 0.0 }
 0x20f   :  { %v386_v5 = vadd.f32 %v385_v48, %v384_v44  ;;  %v410_v17 = vadd.f32 %v409_v49, %v408_v46  ;;  %v580_v44 = vsel %vm377_vm6, %v571_v4, 0.0  ;;  %v555_v46 = vadd.f32 %v554_v57, %v553_v52 }
 0x210   :  { %v1649_v11 = vpop.permute.xlu1 %530  ;;  %v389_v7 = vsel %vm377_vm6, %v375_v50, 0.0  ;;  %v413_v8 = vsel %vm377_vm6, %v400_v51, 0.0  ;;  %v579_v48 = vadd.f32 %v578_v55, %v577_v20  ;;  %v637_v42 = vsel %vm377_vm6, %v629_v60, 0.0 }
 0x211   :  { %v549_v51 = vmul.f32 %v1649_v11, %v1668_v21  ;;  %v573_v59 = vmul.f32 %v1649_v11, %v1673_v22  ;;  %v557_v29 = vadd.f32 %v556_v43, %v555_v46  ;;  %v631_v16 = vmul.f32 %v1610_v41, %v1591_v62 }
 0x212   :  { %v581_v14 = vadd.f32 %v580_v44, %v579_v48  ;;  %v558_v45 = vsel %vm377_vm6, %v548_v23, 0.0  ;;  %v582_v52 = vsel %vm377_vm6, %v572_v36, 0.0  ;;  %v550_v11 = vmul.f32 %v1633_v61, %v1705_v63 }
 0x213   :  { %v1675_v25 = vpop.permute.xlu2 %448  ;;  %v574_v60 = vmul.f32 %v1633_v61, %v1710_v27  ;;  %v560_v3 = vsel %vm377_vm6, %v549_v51, 0.0  ;;  %v584_v4 = vsel %vm377_vm6, %v573_v59, 0.0  ;;  %v559_v41 = vadd.f32 %v558_v45, %v557_v29 }
 0x214   :  { %v458_v57 = vmul.f32 %v1621_v47, %v1654_v12  ;;  %v634_v46 = vmul.f32 %v1641_v2, %v1705_v63  ;;  %v459_v29 = vmul.f32 %v1631_v56, %v1668_v21  ;;  %v660_v45 = vmul.f32 %v1635_v0, %v1659_v58 }
 0x219   :  { %v357_v28 = vpop.permute.xlu1 %356 }
 0x21a   :  { %v374_v32 = vmul.f32 %v357_v28, %v1705_v63  ;;  %v399_v13 = vmul.f32 %v357_v28, %v1710_v27 }
 0x21c   :  { %v387_v40 = vsel %vm377_vm6, %v374_v32, 0.0  ;;  %v411_v6 = vsel %vm377_vm6, %v399_v13, 0.0  ;;  %v367_v9 = vpop.permute.xlu2 %366  ;;  %v638_v32 = vsel %vm377_vm6, %v630_v37, 0.0  ;;  %v632_v13 = vmul.f32 %v1635_v0, %v1654_v12 }
 0x21d   :  { %v388_v10 = vadd.f32 %v387_v40, %v386_v5  ;;  %v412_v15 = vadd.f32 %v411_v6, %v410_v17  ;;  %v376_v18 = vmul.f32 %v367_v9, %v1721_v31  ;;  %v401_v19 = vmul.f32 %v367_v9, %v1726_v1  ;;  %v543_v17 = vpop.permute.xlu0 %542 }
 0x21e   :  { %v639_v62 = vadd.f32 %v638_v32, %v637_v42  ;;  %v583_v5 = vadd.f32 %v582_v52, %v581_v14  ;;  %v640_v40 = vsel %vm377_vm6, %v631_v16, 0.0  ;;  %v562_v6 = vsel %vm377_vm6, %v550_v11, 0.0 }
 0x21f   :  { %v390_v24 = vadd.f32 %v389_v7, %v388_v10  ;;  %v414_v26 = vadd.f32 %v413_v8, %v412_v15  ;;  %v391_v30 = vsel %vm377_vm6, %v376_v18, 0.0  ;;  %v415_v33 = vsel %vm377_vm6, %v401_v19, 0.0 }
 0x220   :  { %v561_v7 = vadd.f32 %v560_v3, %v559_v41  ;;  %v585_v8 = vadd.f32 %v584_v4, %v583_v5  ;;  %v586_v9 = vsel %vm377_vm6, %v574_v60, 0.0  ;;  %v642_v61 = vsel %vm377_vm6, %v632_v13, 0.0 }
 0x221   :  { %v392_v49 = vadd.f32 %v391_v30, %v390_v24  ;;  %v416_v50 = vadd.f32 %v415_v33, %v414_v26  ;;  %v552_v10 = vmul.f32 %v543_v17, %v1721_v31  ;;  %v576_v15 = vmul.f32 %v543_v17, %v1726_v1 }
 0x222   :  { %v445_v28 = vpop.permute.xlu1 %444  ;;  %v633_v18 = vmul.f32 %v1629_v54, %v1668_v21  ;;  %v641_v19 = vadd.f32 %v640_v40, %v639_v62  ;;  %v487_v24 = vmul.f32 %v1621_v47, %v1659_v58  ;;  %v563_v30 = vadd.f32 %v562_v6, %v561_v7 }
 0x223   :  { %393 = vst.msk [vmem:[#allocation3] sm:$0x3] %vm377_vm6, %v392_v49  ;;  %418 = vrot.lane.b32.xlu1 %v416_v50, %s1248_s19  ;;  %v587_v33 = vadd.f32 %v586_v9, %v585_v8  ;;  %v566_v43 = vsel %vm377_vm6, %v552_v10, 0.0  ;;  %v590_v44 = vsel %vm377_vm6, %v576_v15, 0.0  ;;  %v468_v47 = vsel %vm377_vm6, %v458_v57, 0.0 }
 0x224   :  { %v643_v26 = vadd.f32 %v642_v61, %v641_v19  ;;  %v644_v12 = vsel %vm377_vm6, %v633_v18, 0.0  ;;  %v497_v42 = vsel %vm377_vm6, %v487_v24, 0.0  ;;  %v488_v14 = vmul.f32 %v1631_v56, %v1673_v22 }
 0x225   :  { %v627_v50 = vpop.permute.xlu2 %626  ;;  %v646_v52 = vsel %vm377_vm6, %v634_v46, 0.0  ;;  %v460_v11 = vmul.f32 %v445_v28, %v1705_v63  ;;  %v489_v60 = vmul.f32 %v445_v28, %v1710_v27  ;;  %v469_v13 = vadd.f32 %v468_v47, %v1604_v38  ;;  %v1151_v46 = vld [vmem:[%s1923_s7 + $0x70] sm:$0xff]  ;;  %v1141_v47 = vld [vmem:[%s1923_s7 + $0x20] sm:$0xff] }
 0x226   :  { %v645_v16 = vadd.f32 %v644_v12, %v643_v26  ;;  %v636_v32 = vmul.f32 %v627_v50, %v1721_v31  ;;  %v498_v56 = vadd.f32 %v497_v42, %v1606_v39  ;;  %v661_v0 = vmul.f32 %v1629_v54, %v1673_v22  ;;  %v1143_v12 = vld [vmem:[%s1923_s7 + $0x30] sm:$0xff]  ;;  %v1148_v42 = vld [vmem:[%s1923_s7 + $0x58] sm:$0xff] }
 0x227   :  { %v470_v58 = vsel %vm377_vm6, %v459_v29, 0.0  ;;  %v499_v4 = vsel %vm377_vm6, %v488_v14, 0.0  ;;  %v670_v41 = vsel %vm377_vm6, %v660_v45, 0.0  ;;  %v461_v63 = vmul.f32 %v1675_v25, %v1684_v34  ;;  %v1139_v29 = vld [vmem:[%s1923_s7 + $0x10] sm:$0xff]  ;;  %v1146_v45 = vld [vmem:[%s1923_s7 + $0x48] sm:$0xff] }
 0x228   :  { %v647_v62 = vadd.f32 %v646_v52, %v645_v16  ;;  %v650_v38 = vsel %vm377_vm6, %v636_v32, 0.0  ;;  %v490_v39 = vmul.f32 %v1675_v25, %v1689_v35  ;;  %v472_v5 = vsel %vm377_vm6, %v460_v11, 0.0  ;;  %v1147_v14 = vld [vmem:[%s1923_s7 + $0x50] sm:$0xff]  ;;  %v1138_v16 = vld [vmem:[%s1923_s7 + $0x8] sm:$0xff]  ;;  %v1137_v52 = vld [vmem:[%s1923_s7] sm:$0xff] }
 0x229   :  { %v501_v54 = vsel %vm377_vm6, %v489_v60, 0.0  ;;  %v471_v17 = vadd.f32 %v470_v58, %v469_v13  ;;  %v500_v40 = vadd.f32 %v499_v4, %v498_v56  ;;  %v671_v7 = vadd.f32 %v670_v41, %v1627_v53  ;;  %v1145_v32 = vld [vmem:[%s1923_s7 + $0x40] sm:$0xff] }
 0x22a   :  { %v662_v61 = vmul.f32 %v1641_v2, %v1710_v27  ;;  %v474_v10 = vsel %vm377_vm6, %v461_v63, 0.0  ;;  %v503_v25 = vsel %vm377_vm6, %v490_v39, 0.0 }
 0x22b   :  { %v539_v20 = vpop.permute.xlu1 %538  ;;  %v473_v8 = vadd.f32 %v472_v5, %v471_v17  ;;  %v502_v9 = vadd.f32 %v501_v54, %v500_v40 }
 0x22c   :  { %v551_v55 = vmul.f32 %v539_v20, %v1684_v34  ;;  %v575_v23 = vmul.f32 %v539_v20, %v1689_v35 }
 0x22d   :  { %v504_v57 = vadd.f32 %v503_v25, %v502_v9 }
 0x22e   :  { %v564_v36 = vsel %vm377_vm6, %v551_v55, 0.0  ;;  %v588_v37 = vsel %vm377_vm6, %v575_v23, 0.0  ;;  %v475_v55 = vadd.f32 %v474_v10, %v473_v8  ;;  %v674_v23 = vsel %vm377_vm6, %v662_v61, 0.0 }
 0x22f   :  { %v565_v48 = vadd.f32 %v564_v36, %v563_v30  ;;  %v589_v49 = vadd.f32 %v588_v37, %v587_v33  ;;  %v664_v33 = vmul.f32 %v627_v50, %v1726_v1  ;;  %v1150_v50 = vld [vmem:[%s1923_s7 + $0x68] sm:$0xff] }
 0x231   :  { %v567_v51 = vadd.f32 %v566_v43, %v565_v48  ;;  %v591_v59 = vadd.f32 %v590_v44, %v589_v49  ;;  %v678_v36 = vsel %vm377_vm6, %v664_v33, 0.0  ;;  %v1144_v44 = vld [vmem:[%s1923_s7 + $0x38] sm:$0xff]  ;;  %v1142_v49 = vld [vmem:[%s1923_s7 + $0x28] sm:$0xff] }
 0x232   :  { %826 = vmatpush.bf16.msra.mxu0 %v1144_v44 }
 0x233   :  { %568 = vst.msk [vmem:[#allocation3 + $0x2] sm:$0x3] %vm377_vm6, %v567_v51  ;;  %593 = vrot.lane.b32.xlu2 %v591_v59, %s1248_s19  ;;  %v1149_v51 = vld [vmem:[%s1923_s7 + $0x60] sm:$0xff]  ;;  %v1140_v59 = vld [vmem:[%s1923_s7 + $0x18] sm:$0xff] }
 0x234   :  { %v623_v21 = vpop.permute.xlu1 %622 }
 0x235   :  { %v635_v3 = vmul.f32 %v623_v21, %v1684_v34  ;;  %v672_v34 = vsel %vm377_vm6, %v661_v0, 0.0  ;;  %v663_v18 = vmul.f32 %v623_v21, %v1689_v35 }
 0x236   :  { %v673_v20 = vadd.f32 %v672_v34, %v671_v7  ;;  %827 = vmatpush.bf16.msra.mxu0 %v1143_v12 }
 0x237   :  { %v648_v28 = vsel %vm377_vm6, %v635_v3, 0.0  ;;  %v676_v30 = vsel %vm377_vm6, %v663_v18, 0.0  ;;  %v1154_v18 = vld [vmem:[%s1927_s11 + $0x8] sm:$0xff] }
 0x238   :  { %v649_v22 = vadd.f32 %v648_v28, %v647_v62  ;;  %v675_v35 = vadd.f32 %v674_v23, %v673_v20  ;;  %v1202_v62 = vld [vmem:[%s1924_s8] ss:$0 sm:$0xff]  ;;  %923 = vmatpush.bf16.msra.mxu2 %v1154_v18 }
 0x23a   :  { %v651_v6 = vadd.f32 %v650_v38, %v649_v22  ;;  %828 = vmatpush.bf16.msra.mxu0 %v1142_v49  ;;  %v1251_v22 = vmov 32.0  }
 0x23b   :  { %1228 = vrcp.f32 %v1251_v22 }
 0x23c   :  { %653 = vrot.lane.b32.xlu1 %v651_v6, %s1249_s1 }
 0x23d   :  { %v453_v15 = vpop.permute.xlu1 %452 }
 0x23e   :  { %v462_v19 = vmul.f32 %v453_v15, %v1721_v31  ;;  %v491_v53 = vmul.f32 %v453_v15, %v1726_v1  ;;  %v677_v31 = vadd.f32 %v676_v30, %v675_v35  ;;  %v1152_v1 = vld [vmem:[%s1923_s7 + $0x78] sm:$0xff]  ;;  %829 = vmatpush.bf16.msra.mxu0 %v1141_v47  ;;  %v1203_v30 = vld [vmem:[%s1925_s9] ss:$0 sm:$0xff] }
 0x23f   :  { %839 = vmatpush.bf16.msra.mxu1 %v1152_v1  ;;  %v1205_v1 = vld [vmem:[%s1928_s12] ss:$0 sm:$0xff] }
 0x240   :  { %v476_v2 = vsel %vm377_vm6, %v462_v19, 0.0  ;;  %v505_v27 = vsel %vm377_vm6, %v491_v53, 0.0  ;;  %v679_v37 = vadd.f32 %v678_v36, %v677_v31  ;;  %v1153_v19 = vld [vmem:[%s1927_s11] sm:$0xff] }
 0x241   :  { %v506_v24 = vadd.f32 %v505_v27, %v504_v57  ;;  %v477_v26 = vadd.f32 %v476_v2, %v475_v55  ;;  %v1229_v17 = vpop.eup %1228  ;;  %924 = vmatpush.bf16.msra.mxu2 %v1153_v19  ;;  %v1204_v31 = vld [vmem:[%s1926_s10] ss:$0 sm:$0xff] }
 0x242   :  { %830 = vmatpush.bf16.msra.mxu0 %v1140_v59  ;;  %v858_v40 = vmul.f32 32.0, %v1229_v17  ;;  %vm862_vm10 = vweird.f32 %v1229_v17 }
 0x243   :  { %508 = vrot.lane.b32.xlu2 %v506_v24, %s1250_s26  ;;  %479 = vrot.lane.b32.xlu0 %v477_v26, %s1249_s1 }
 0x244   :  { %840 = vmatpush.bf16.msra.mxu1 %v1151_v46  ;;  %v859_v6 = vsub.f32 1.0, %v858_v40 }
 0x246   :  { %831 = vmatpush.bf16.msra.mxu0 %v1139_v29  ;;  %v860_v7 = vmul.f32 %v1229_v17, %v859_v6  ;;  %v1209_v6 = vld [vmem:[#allocation4] ss:$0 sm:$0xff] }
 0x248   :  { %841 = vmatpush.bf16.msra.mxu1 %v1150_v50  ;;  %v861_v8 = vadd.f32 %v1229_v17, %v860_v7  ;;  %v1252_v50 = vmov 16.0  }
 0x24a   :  { %832 = vmatpush.bf16.msra.mxu0 %v1138_v16  ;;  %v863_v9 = vsel %vm862_vm10, %v1229_v17, %v861_v8 }
 0x24b   :  { %681 = vrot.lane.b32.xlu0 %v679_v37, %s1250_s26 }
 0x24c   :  { %842 = vmatpush.bf16.msra.mxu1 %v1149_v51 }
 0x24e   :  { %833 = vmatpush.bf16.msra.mxu0 %v1137_v52 }
 0x250   :  { %843 = vmatpush.bf16.msra.mxu1 %v1148_v42 }
 0x254   :  { %844 = vmatpush.bf16.msra.mxu1 %v1147_v14 }
 0x258   :  { %845 = vmatpush.bf16.msra.mxu1 %v1146_v45 }
 0x25c   :  { %846 = vmatpush.bf16.msra.mxu1 %v1145_v32 }
 0x28d   :  { %v594_v43 = vpop.permute.xlu2 %593 }
 0x28e   :  { %596 = vst.msk [vmem:[#allocation3 + $0x2] sm:$0x3] %vm421_vm7, %v594_v43 }
 0x295   :  { %v419_v48 = vpop.permute.xlu1 %418 }
 0x296   :  { %422 = vst.msk [vmem:[#allocation3] sm:$0x3] %vm421_vm7, %v419_v48 }
 0x29d   :  { %v509_v21 = vpop.permute.xlu2 %508 }
 0x2ae   :  { %v654_v11 = vpop.permute.xlu1 %653 }
 0x2af   :  { %656 = vst.msk [vmem:[#allocation3 + $0x2] sm:$0x3] %vm482_vm8, %v654_v11 }
 0x2b5   :  { %v480_v60 = vpop.permute.xlu0 %479 }
 0x2b6   :  { %483 = vst.msk [vmem:[#allocation3] sm:$0x3] %vm482_vm8, %v480_v60 }
 0x2b7   :  { %512 = vst.msk [vmem:[#allocation3] sm:$0x3] %vm511_vm9, %v509_v21 }
 0x2bd   :  { %v682_v13 = vpop.permute.xlu0 %681 }
 0x2be   :  { %684 = vst.msk [vmem:[#allocation3 + $0x2] sm:$0x3] %vm511_vm9, %v682_v13 }
 0x2c5   :  { %v685_v56 = vld [vmem:[#allocation3] sm:$0xf] }
 0x2c6   :  { %687 = vst [vmem:[#allocation1] ss:$4 sm:$0xff] %v685_v56 }
 0x2cd   :  { %v688_v3 = vld.sshfl [vmem:[#allocation1] sm:$0xff pattern:$0x73625140]  ;;  %v689_v0 = vld.sshfl [vmem:[#allocation1 + $0x8] sm:$0xff pattern:$0x73625140] }
 0x2ce   :  { %v692_v58 = vpack.c.bf16 %v688_v3, %v688_v3  ;;  %v693_v4 = vpack.c.bf16 %v689_v0, %v689_v0 }
 0x2d0   :  { %834 = vmatmul.bf16.vlgmr.msra.gmra.mxu0 %v692_v58  ;;  %847 = vmatmul.bf16.vlgmr.msra.gmra.mxu1 %v693_v4 }
 0x34d   :  { %v835_v41 = vpop.f32.mrf.mxu0  ;;  %v848_v63 = vpop.f32.mrf.mxu1 }
 0x34e   :  { %v836_v28 = vadd.f32 %v1202_v62, %v835_v41  ;;  %v1206_v41 = vld [vmem:[%s1929_s13] ss:$0 sm:$0xff] }
 0x350   :  { %v849_v38 = vadd.f32 %v848_v63, %v836_v28 }
 0x352   :  { %v854_v39 = vsel %vm377_vm6, %v849_v38, 0.0 }
 0x353   :  { %855 = vadd.xlane.f32.xlu1 %v854_v39 }
 0x355   :  { %v837_v5 = vpop.f32.mrf.mxu0  ;;  %v850_v54 = vpop.f32.mrf.mxu1 }
 0x356   :  { %v1208_v54 = vld [vmem:[%s1931_s15] ss:$0 sm:$0xff] }
 0x3c6   :  { %v856_v34 = vpop.xlane.xlu1 %855 }
 0x3c7   :  { %v864_v61 = vmul.f32 %v863_v9, %v856_v34 }
 0x3c9   :  { %v865_v10 = vsub.f32 %v849_v38, %v864_v61  ;;  %v1207_v38 = vld [vmem:[%s1930_s14] ss:$0 sm:$0xff] }
 0x3cb   :  { %v866_v25 = vmul.f32 %v865_v10, %v865_v10 }
 0x3cd   :  { %v867_v15 = vsel %vm377_vm6, %v866_v25, 0.0 }
 0x3ce   :  { %868 = vadd.xlane.f32.xlu2 %v867_v15 }
 0x441   :  { %v869_v53 = vpop.xlane.xlu2 %868 }
 0x442   :  { %v870_v20 = vmul.f32 %v869_v53, %v863_v9 }
 0x444   :  { %v871_v57 = vadd.f32 1e-05, %v870_v20 }
 0x446   :  { %1230 = vrsqrt.f32 %v871_v57  ;;  %vm878_vm12 = vweird.f32 %v871_v57 }
 0x447   :  { %1232 = vrcp.f32 %v1252_v50 }
 0x44c   :  { %v1231_v55 = vpop.eup %1230 }
 0x44d   :  { %v873_v23 = vmul.f32 %v1231_v55, %v871_v57  ;;  %vm879_vm11 = vweird.f32 %v1231_v55  ;;  %v1233_v47 = vpop.eup %1232 }
 0x44e   :  { %vm880_vm13 = vmor %vm878_vm12, %vm879_vm11  ;;  %v937_v51 = vmul.f32 16.0, %v1233_v47  ;;  %vm941_vm15 = vweird.f32 %v1233_v47 }
 0x44f   :  { %v874_v2 = vmul.f32 %v1231_v55, %v873_v23 }
 0x450   :  { %v938_v59 = vsub.f32 1.0, %v937_v51 }
 0x451   :  { %v875_v27 = vmul.f32 0.5, %v874_v2 }
 0x452   :  { %v939_v42 = vmul.f32 %v1233_v47, %v938_v59 }
 0x453   :  { %v876_v24 = vsub.f32 1.5, %v875_v27 }
 0x454   :  { %v940_v29 = vadd.f32 %v1233_v47, %v939_v42 }
 0x455   :  { %v877_v26 = vmul.f32 %v1231_v55, %v876_v24 }
 0x456   :  { %v942_v14 = vsel %vm941_vm15, %v1233_v47, %v940_v29 }
 0x457   :  { %v881_v33 = vsel %vm880_vm13, %v1231_v55, %v877_v26 }
 0x458   :  { %v882_v35 = vmul.f32 %v881_v33, %v865_v10 }
 0x45a   :  { %v886_v36 = vmul.f32 %v1203_v30, %v882_v35 }
 0x45c   :  { %v890_v37 = vadd.f32 %v1204_v31, %v886_v36 }
 0x45e   :  { %v891_v43 = vmax.f32 %v890_v37, 0.0 }
 0x460   :  { %v892_v44 = vpack.c.bf16 %v891_v43, %v891_v43 }
 0x462   :  { %1124 = vmatmul.msk.bf16.vlgmr.msra.gmra.mxu2 %vm110_vm0, %v892_v44 }
 0x4e5   :  { %v926_v12 = vpop.f32.mrf.mxu2 }
 0x4e6   :  { %v927_v46 = vadd.f32 %v1205_v1, %v926_v12 }
 0x4e8   :  { %v933_v48 = vsel %vm932_vm14, %v927_v46, 0.0 }
 0x4e9   :  { %934 = vadd.xlane.f32.xlu0 %v933_v48 }
 0x4ed   :  { %v928_v49 = vpop.f32.mrf.mxu2 }
 0x55c   :  { %v935_v16 = vpop.xlane.xlu0 %934 }
 0x55d   :  { %v943_v45 = vmul.f32 %v942_v14, %v935_v16 }
 0x55f   :  { %v944_v52 = vsub.f32 %v927_v46, %v943_v45 }
 0x561   :  { %v945_v32 = vmul.f32 %v944_v52, %v944_v52 }
 0x563   :  { %v946_v11 = vsel %vm932_vm14, %v945_v32, 0.0 }
 0x564   :  { %947 = vadd.xlane.f32.xlu2 %v946_v11 }
 0x5d7   :  { %v948_v60 = vpop.xlane.xlu2 %947 }
 0x5d8   :  { %v949_v21 = vmul.f32 %v948_v60, %v942_v14 }
 0x5da   :  { %v950_v13 = vadd.f32 1e-05, %v949_v21 }
 0x5dc   :  { %1234 = vrsqrt.f32 %v950_v13  ;;  %vm957_vm1 = vweird.f32 %v950_v13 }
 0x5e2   :  { %v1235_v56 = vpop.eup %1234 }
 0x5e3   :  { %v952_v3 = vmul.f32 %v1235_v56, %v950_v13  ;;  %vm958_vm0 = vweird.f32 %v1235_v56 }
 0x5e4   :  { %vm959_vm2 = vmor %vm957_vm1, %vm958_vm0 }
 0x5e5   :  { %v953_v0 = vmul.f32 %v1235_v56, %v952_v3 }
 0x5e7   :  { %v954_v58 = vmul.f32 0.5, %v953_v0 }
 0x5e9   :  { %v955_v4 = vsub.f32 1.5, %v954_v58 }
 0x5eb   :  { %v956_v62 = vmul.f32 %v1235_v56, %v955_v4 }
 0x5ed   :  { %v960_v63 = vsel %vm959_vm2, %v1235_v56, %v956_v62 }
 0x5ee   :  { %v961_v28 = vmul.f32 %v960_v63, %v944_v52 }
 0x5f0   :  { %v965_v39 = vmul.f32 %v1206_v41, %v961_v28 }
 0x5f2   :  { %v969_v5 = vadd.f32 %v1207_v38, %v965_v39 }
 0x5f4   :  { %v970_v22 = vmax.f32 %v969_v5, 0.0 }
 0x5f6   :  { %v975_v17 = vmul.f32 %v1208_v54, %v970_v22 }
 0x5f8   :  { %v976_v40 = vsel %vm932_vm14, %v975_v17, 0.0 }
 0x5f9   :  { %977 = vadd.xlane.f32.xlu1 %v976_v40 }
 0x66c   :  { %v978_v7 = vpop.xlane.xlu1 %977 }
 0x66d   :  { %v983_v8 = vadd.f32 %v1209_v6, %v978_v7 }
 0x66f   :  { %985 = vst.msk [vmem:[%s1933_s17] sm:$0x3] %vm984_vm3, %v983_v8 }

</bundles_post_ra>
